<compile_context>
chip_gen: v7x
topology: tpu7x:2x2x1
jax: 0.10.0
libtpu: 0.0.40
codegen_flags: <defaults>
</compile_context>

<pallas_src>
import functools

import jax
import jax.numpy as jnp
from jax.experimental import pallas as pl
from jax.experimental.pallas import tpu as pltpu


def _round_up(n, m):
    return ((n + m - 1) // m) * m


def _nbytes(a):
    return a.size * a.dtype.itemsize


# --------------------------------------------------------------------------
# Kernel
# --------------------------------------------------------------------------
def _se_head_kernel(x_ref, w1t_ref, w2t_ref, wft_ref, bf_ref, out_ref):
    """One grid step processes TB batch rows.

    x_ref   : (TB, C, HW)  backbone features, native NCHW layout (H*W flattened)
    w1t_ref : (C, Cr)      SE fc1 weight, pre-transposed (PyTorch stores (out, in))
    w2t_ref : (Cr, C)      SE fc2 weight, pre-transposed
    wft_ref : (C, NCp)     final_fc weight, pre-transposed + lane-padded to 128
    bf_ref  : (1, NCp)     final_fc bias, lane-padded
    out_ref : (TB, NCp)    logits (padded lanes sliced off outside)
    """
    x = x_ref[...]
    if x.dtype != jnp.float32:
        x = x.astype(jnp.float32)           # bf16-streamed inputs: accumulate in f32
    hw = x.shape[-1]

    # SEBlock squeeze == adaptive_avg_pool2d(1): spatial mean.  x is read from
    # HBM exactly once; the HW reduction happens in-VMEM.
    y = jnp.sum(x, axis=-1) * jnp.float32(1.0 / hw)                      # (TB, C)

    # SE excitation: Linear -> ReLU -> Linear -> Sigmoid (sigmoid on the EUP).
    h = jnp.maximum(
        jnp.dot(y, w1t_ref[...].astype(jnp.float32),
                preferred_element_type=jnp.float32), 0.0)                # (TB, Cr)
    s = jax.nn.sigmoid(
        jnp.dot(h, w2t_ref[...].astype(jnp.float32),
                preferred_element_type=jnp.float32))                     # (TB, C)

    # Fold channel re-weighting into the second pool:
    #   mean_hw(x * s) == s * mean_hw(x) == s * y   (s is constant over HW).
    z = y * s                                                            # (TB, C)

    out = jnp.dot(z, wft_ref[...].astype(jnp.float32),
                  preferred_element_type=jnp.float32)
    out = out + bf_ref[...].astype(jnp.float32)
    out_ref[...] = out.astype(out_ref.dtype)


# --------------------------------------------------------------------------
# One-time parameter preparation (call once, reuse every step)
# --------------------------------------------------------------------------
def prepare_head_params(w1, w2, wf, bf, param_dtype=None):
    """Hoisted out of the per-call jit:
       * transpose Linear weights from PyTorch's (out, in) to (in, out),
       * lane-pad final_fc out-features to a multiple of 128,
       * optionally down-cast weights (e.g. jnp.bfloat16) to halve HBM/VMEM.
    Returns (w1t, w2t, wft, bf2)."""
    nc, _ = wf.shape
    ncp = _round_up(nc, 128)
    w1t = jnp.asarray(w1).T                                              # (C, Cr)
    w2t = jnp.asarray(w2).T                                              # (Cr, C)
    wft = jnp.pad(jnp.asarray(wf).T, ((0, 0), (0, ncp - nc)))            # (C, NCp)
    bf2 = jnp.pad(jnp.asarray(bf).reshape(1, nc),
                  ((0, 0), (0, ncp - nc))).astype(jnp.float32)           # (1, NCp)
    if param_dtype is not None:
        w1t, w2t, wft = (a.astype(param_dtype) for a in (w1t, w2t, wft))
    return w1t, w2t, wft, bf2


def _choose_tb(b, c, hw, x_itemsize, w_vmem_bytes):
    """Largest multiple-of-8 batch tile that fits the VMEM budget; when the
    batch allows it, keep >= 2 grid steps so the "parallel" batch axis feeds
    both TensorCores on v7x."""
    # x blocks are double-buffered; the minor (HW) dim is lane-padded to 128.
    per_b = 2 * c * _round_up(hw, 128) * x_itemsize
    budget = max(0, (40 << 20) - w_vmem_bytes)   # headroom inside the 64 MiB limit
    max_tb = max(8, budget // max(per_b, 1))
    b8 = _round_up(b, 8)
    cands = [t for t in (64, 32, 16, 8) if t <= max_tb and t <= b8 and b8 % t == 0]
    if not cands:
        return 8
    for t in cands:                 # descending: biggest tile with >= 2 steps
        if b8 // t >= 2:
            return t
    return cands[-1]


# --------------------------------------------------------------------------
# Jitted forward (post-backbone head)
# --------------------------------------------------------------------------
@functools.partial(jax.jit, static_argnames=("num_classes",))
def inception_v3_attention_head(x, w1t, w2t, wft, bf2, *, num_classes):
    """x: (B, C, H, W) backbone features (NCHW, f32 or bf16).
    Returns (B, num_classes) f32 logits."""
    B, C, H, W = x.shape
    HW = H * W
    Cr = w1t.shape[1]
    NCp = wft.shape[1]

    # Free reshape: NCHW row-major is already (B, C, H*W).  No relayout pass.
    x3 = x.reshape(B, C, HW)

    # Conservative weight-VMEM estimate (double-buffered, bias sublane-padded).
    w_vmem = 2 * (_nbytes(w1t) + _nbytes(w2t) + _nbytes(wft)
                  + 8 * NCp * bf2.dtype.itemsize)
    TB = _choose_tb(B, C, HW, x.dtype.itemsize, w_vmem)
    B_pad = _round_up(B, TB)
    if B_pad != B:                   # only when B % 8 != 0 (zero rows are benign)
        x3 = jnp.pad(x3, ((0, B_pad - B), (0, 0), (0, 0)))

    out_pad = pl.pallas_call(
        _se_head_kernel,
        out_shape=jax.ShapeDtypeStruct((B_pad, NCp), jnp.float32),
        grid_spec=pltpu.PrefetchScalarGridSpec(
            num_scalar_prefetch=0,
            grid=(B_pad // TB,),
            in_specs=[
                pl.BlockSpec((TB, C, HW), lambda b: (b, 0, 0)),
                pl.BlockSpec((C, Cr), lambda b: (0, 0)),
                pl.BlockSpec((Cr, C), lambda b: (0, 0)),
                pl.BlockSpec((C, NCp), lambda b: (0, 0)),
                pl.BlockSpec((1, NCp), lambda b: (0, 0)),
            ],
            out_specs=pl.BlockSpec((TB, NCp), lambda b: (b, 0)),
        ),
        compiler_params=pltpu.CompilerParams(
            dimension_semantics=("parallel",),
            vmem_limit_bytes=64 * 1024 * 1024,
        ),
    )(x3, w1t, w2t, wft, bf2)

    return out_pad[:B, :num_classes]


# --------------------------------------------------------------------------
# Pure-JAX reference mirroring the PyTorch forward semantics
# --------------------------------------------------------------------------
def _reference(x, w1, w2, wf, bf):
    y = jnp.mean(x, axis=(2, 3))                   # AdaptiveAvgPool2d(1) + view(b, c)
    y = jnp.maximum(y @ w1.T, 0.0)                 # Linear(C, C//r, bias=False) + ReLU
    y = jax.nn.sigmoid(y @ w2.T)                   # Linear(C//r, C, bias=False) + Sigmoid
    xs = x * y[:, :, None, None]                   # x * y
    z = jnp.mean(xs, axis=(2, 3))                  # adaptive_avg_pool2d(1,1) + flatten
    return z @ wf.T + bf                           # final_fc


if __name__ == "__main__":
    # Small, module-consistent shapes: the real model has C=2048, HW=8*8,
    # reduction=16, num_classes up to 1000.
    B, C, H, W = 2, 64, 8, 8
    reduction = 16
    num_classes = 10
    Cr = C // reduction

    key = jax.random.PRNGKey(0)
    kx, k1, k2, k3, k4 = jax.random.split(key, 5)

    x = jax.random.normal(kx, (B, C, H, W), dtype=jnp.float32)
    # PyTorch nn.Linear weight shape is (out_features, in_features).
    w1 = jax.random.normal(k1, (Cr, C), dtype=jnp.float32) * 0.1            # SE fc1, no bias
    w2 = jax.random.normal(k2, (C, Cr), dtype=jnp.float32) * 0.1            # SE fc2, no bias
    wf = jax.random.normal(k3, (num_classes, C), dtype=jnp.float32) * 0.1   # final_fc weight
    bf = jax.random.normal(k4, (num_classes,), dtype=jnp.float32) * 0.1     # final_fc bias

    # One-time weight prep (use param_dtype=jnp.bfloat16 in production to halve
    # weight HBM/VMEM traffic; kept f32 here for an exact reference check).
    params = prepare_head_params(w1, w2, wf, bf)

    out = inception_v3_attention_head(x, *params, num_classes=num_classes)
    out = jax.block_until_ready(out)

    ref = _reference(x, w1, w2, wf, bf)
    assert out.shape == (B, num_classes), out.shape
    assert jnp.allclose(out, ref, atol=1e-4, rtol=1e-4), (out, ref)

    print("KERNEL_OK")
</pallas_src>

<mosaic_0001>
module attributes {stable_mosaic.version = 11 : i64} {
  func.func @_se_head_kernel(%arg0: i32, %arg1: memref<8x64x64xf32, #tpu.memory_space<vmem>>, %arg2: memref<64x4xf32, #tpu.memory_space<vmem>>, %arg3: memref<4x64xf32, #tpu.memory_space<vmem>>, %arg4: memref<64x128xf32, #tpu.memory_space<vmem>>, %arg5: memref<1x128xf32, #tpu.memory_space<vmem>>, %arg6: memref<8x128xf32, #tpu.memory_space<vmem>>) attributes {dimension_semantics = [#tpu.dimension_semantics<parallel>], iteration_bounds = array<i64: 1>, scalar_prefetch = 0 : i64, scratch_operands = 0 : i64, tpu.core_type = #tpu.core_type<tc>, window_params = [{transform_indices = @transform_0, window_bounds = array<i64: 8, 64, 64>}, {pipeline_mode = #tpu.pipeline_mode<synchronous>, transform_indices = @transform_1, window_bounds = array<i64: 64, 4>}, {pipeline_mode = #tpu.pipeline_mode<synchronous>, transform_indices = @transform_2, window_bounds = array<i64: 4, 64>}, {pipeline_mode = #tpu.pipeline_mode<synchronous>, transform_indices = @transform_3, window_bounds = array<i64: 64, 128>}, {pipeline_mode = #tpu.pipeline_mode<synchronous>, transform_indices = @transform_4, window_bounds = array<i64: 1, 128>}, {transform_indices = @transform_5, window_bounds = array<i64: 8, 128>}]} {
    %c0 = arith.constant 0 : index
    %c0_0 = arith.constant 0 : index
    %c0_1 = arith.constant 0 : index
    %0 = vector.load %arg1[%c0, %c0_0, %c0_1] : memref<8x64x64xf32, #tpu.memory_space<vmem>>, vector<8x64x64xf32>
    %cst = arith.constant dense<0.000000e+00> : vector<8x64xf32>
    %1 = vector.multi_reduction <add>, %0, %cst [2] : vector<8x64x64xf32> to vector<8x64xf32>
    %cst_2 = arith.constant 1.562500e-02 : f32
    %2 = vector.broadcast %cst_2 : f32 to vector<8x64xf32>
    %3 = arith.mulf %1, %2 : vector<8x64xf32>
    %c0_3 = arith.constant 0 : index
    %c0_4 = arith.constant 0 : index
    %4 = vector.load %arg2[%c0_3, %c0_4] : memref<64x4xf32, #tpu.memory_space<vmem>>, vector<64x4xf32>
    %cst_5 = arith.constant dense<0.000000e+00> : vector<8x4xf32>
    %5 = tpu.matmul %3, %4, %cst_5 {dimension_numbers = #tpu.dot_dimension_numbers<[1], [0], [0], [1], [0, 0, 1, 1], [], []>} : vector<8x64xf32>, vector<64x4xf32>, vector<8x4xf32> -> vector<8x4xf32>
    %cst_6 = arith.constant 0.000000e+00 : f32
    %6 = vector.broadcast %cst_6 : f32 to vector<8x4xf32>
    %7 = arith.maximumf %5, %6 : vector<8x4xf32>
    %c0_7 = arith.constant 0 : index
    %c0_8 = arith.constant 0 : index
    %8 = vector.load %arg3[%c0_7, %c0_8] : memref<4x64xf32, #tpu.memory_space<vmem>>, vector<4x64xf32>
    %cst_9 = arith.constant dense<0.000000e+00> : vector<8x64xf32>
    %9 = tpu.matmul %7, %8, %cst_9 {dimension_numbers = #tpu.dot_dimension_numbers<[1], [0], [0], [1], [0, 0, 1, 1], [], []>} : vector<8x4xf32>, vector<4x64xf32>, vector<8x64xf32> -> vector<8x64xf32>
    %10 = arith.negf %9 : vector<8x64xf32>
    %11 = math.exp %10 : vector<8x64xf32>
    %cst_10 = arith.constant 1.000000e+00 : f32
    %12 = vector.broadcast %cst_10 : f32 to vector<8x64xf32>
    %13 = arith.addf %12, %11 : vector<8x64xf32>
    %14 = arith.divf %12, %13 : vector<8x64xf32>
    %15 = arith.mulf %3, %14 : vector<8x64xf32>
    %c0_11 = arith.constant 0 : index
    %c0_12 = arith.constant 0 : index
    %16 = vector.load %arg4[%c0_11, %c0_12] : memref<64x128xf32, #tpu.memory_space<vmem>>, vector<64x128xf32>
    %cst_13 = arith.constant dense<0.000000e+00> : vector<8x128xf32>
    %17 = tpu.matmul %15, %16, %cst_13 {dimension_numbers = #tpu.dot_dimension_numbers<[1], [0], [0], [1], [0, 0, 1, 1], [], []>} : vector<8x64xf32>, vector<64x128xf32>, vector<8x128xf32> -> vector<8x128xf32>
    %c0_14 = arith.constant 0 : index
    %c0_15 = arith.constant 0 : index
    %18 = vector.load %arg5[%c0_14, %c0_15] : memref<1x128xf32, #tpu.memory_space<vmem>>, vector<1x128xf32>
    %19 = vector.broadcast %18 : vector<1x128xf32> to vector<8x128xf32>
    %20 = arith.addf %17, %19 : vector<8x128xf32>
    %c0_16 = arith.constant 0 : index
    %c0_17 = arith.constant 0 : index
    %21 = vector.load %arg6[%c0_16, %c0_17] : memref<8x128xf32, #tpu.memory_space<vmem>>, vector<8x128xf32>
    tpu.vector_store %arg6[%c0_16, %c0_17], %20 {strides = array<i32>} : memref<8x128xf32, #tpu.memory_space<vmem>>, vector<8x128xf32>,
    return
  }
  func.func @transform_0(%arg0: i32) -> (i32, i32, i32) {
    %c0_i32 = arith.constant 0 : i32
    %c0_i32_0 = arith.constant 0 : i32
    %c0_i32_1 = arith.constant 0 : i32
    return %arg0, %c0_i32, %c0_i32_0 : i32, i32, i32
  }
  func.func @transform_1(%arg0: i32) -> (i32, i32) {
    %c0_i32 = arith.constant 0 : i32
    %c0_i32_0 = arith.constant 0 : i32
    %c0_i32_1 = arith.constant 0 : i32
    return %c0_i32, %c0_i32_0 : i32, i32
  }
  func.func @transform_2(%arg0: i32) -> (i32, i32) {
    %c0_i32 = arith.constant 0 : i32
    %c0_i32_0 = arith.constant 0 : i32
    %c0_i32_1 = arith.constant 0 : i32
    return %c0_i32, %c0_i32_0 : i32, i32
  }
  func.func @transform_3(%arg0: i32) -> (i32, i32) {
    %c0_i32 = arith.constant 0 : i32
    %c0_i32_0 = arith.constant 0 : i32
    %c0_i32_1 = arith.constant 0 : i32
    return %c0_i32, %c0_i32_0 : i32, i32
  }
  func.func @transform_4(%arg0: i32) -> (i32, i32) {
    %c0_i32 = arith.constant 0 : i32
    %c0_i32_0 = arith.constant 0 : i32
    %c0_i32_1 = arith.constant 0 : i32
    return %c0_i32, %c0_i32_0 : i32, i32
  }
  func.func @transform_5(%arg0: i32) -> (i32, i32) {
    %c0_i32 = arith.constant 0 : i32
    %c0_i32_0 = arith.constant 0 : i32
    return %arg0, %c0_i32 : i32, i32
  }
}

</mosaic_0001>

<bundles_post_ra>
// kernel: inception_v3_attention_head.1
= control target key start
LH: loop header
LB: loop body
LE: loop exit
PB: predicated region body
PF: predicated region fallthrough
CT: control target
= control target key end

     0   :  { %10 = vsyncpa [#allocation3], 0  ;;  %s3235_s0 = inlined_call_operand.hbm [shape: f32[8,64,64], index: 0, kind: input, shape index: {}]   ;;  %s3236_s1 = inlined_call_operand.hbm [shape: f32[64,4], index: 1, kind: input, shape index: {}]   ;;  %s3237_s2 = inlined_call_operand.hbm [shape: f32[4,64], index: 2, kind: input, shape index: {}]   ;;  %s3238_s3 = inlined_call_operand.hbm [shape: f32[64,128], index: 3, kind: input, shape index: {}]   ;;  %s3239_s4 = inlined_call_operand.hbm [shape: f32[1,128], index: 4, kind: input, shape index: {}]   ;;  %s3240_s5 = inlined_call_operand.hbm [shape: f32[8,128], index: 5, kind: output, shape index: {}]  }
   0x1   :  { %11 = vsyncpa [#allocation6], 0 }
   0x2   :  { %12 = vsyncpa [#allocation9], 0 }
   0x3   :  { %13 = vsyncpa [#allocation4], 0  ;;  %s2318_s18 = smov [#allocation5]   ;;  %s2319_s20 = smov [#allocation8]  }
   0x4   :  { %s31_s19 = sshll.u32 %s2318_s18, 4  ;;  %s53_s21 = sshll.u32 %s2319_s20, 4  ;;  %s32_s19 = int_to_ptr.vmem [resolvable:$true] %s31_s19  ;;  %s2360_s21 = int_to_ptr.vmem [resolvable:$true] %s53_s21 }
   0x5   :  { %s2178_s24 = scalar_lea.hbm %s3236_s1, 1024 }
   0x6   :  { %p2179_p0 = scmp.ne.s32.totalorder %s3236_s1, %s2178_s24  ;;  %p2182_p1 = scmp.lt.u32.totalorder %s2178_s24, %s3236_s1 }
   0x8   :  { %p2184_p2 = pnand %p2182_p1, %p2179_p0 }
   0xa   :  { %2187 = shalt.err (!%p2184_p2)
}
   0xb   :  { %s2188_s29 = scalar_lea.vmem %s32_s19, 1024  ;;  %p2193_p4 = scmp.lt.s32.totalorder %s32_s19, %s32_s19 }
   0xc   :  { %p2189_p3 = scmp.ne.s32.totalorder %s32_s19, %s2188_s29  ;;  %p2194_p5 = scmp.lt.s32.totalorder %s2188_s29, %s2188_s29 }
   0xe   :  { %p2195_p6 = por %p2194_p5, %p2193_p4 }
  0x10   :  { %p2196_p7 = pnand %p2195_p6, %p2189_p3 }
  0x12   :  { %2199 = shalt.err (!%p2196_p7)
}
  0x13   :  { %s2320_s30 = smov 128   ;;  %s2321_s6 = smov 8  }
  0x14   :  { %37 = dma.hbm_to_vmem [thread:$0]  %s3236_s1, 1024, %s32_s19, [#allocation6], %s2320_s30, %s2320_s30, %s2321_s6  }
  0x15   :  { %s2200_s11 = scalar_lea.hbm %s3238_s3, 1024 }
  0x16   :  { %p2201_p8 = scmp.ne.s32.totalorder %s3238_s3, %s2200_s11  ;;  %p2204_p9 = scmp.lt.u32.totalorder %s2200_s11, %s3238_s3 }
  0x18   :  { %p2206_p10 = pnand %p2204_p9, %p2201_p8 }
  0x1a   :  { %2209 = shalt.err (!%p2206_p10)
}
  0x1b   :  { %s2210_s16 = scalar_lea.vmem %s2360_s21, 1024  ;;  %p2215_p12 = scmp.lt.s32.totalorder %s2360_s21, %s2360_s21 }
  0x1c   :  { %p2211_p11 = scmp.ne.s32.totalorder %s2360_s21, %s2210_s16  ;;  %p2216_p13 = scmp.lt.s32.totalorder %s2210_s16, %s2210_s16 }
  0x1e   :  { %p2217_p0 = por %p2216_p13, %p2215_p12 }
  0x20   :  { %p2218_p1 = pnand %p2217_p0, %p2211_p11 }
  0x22   :  { %2221 = shalt.err (!%p2218_p1)
}
  0x23   :  { %59 = dma.hbm_to_vmem [thread:$0]  %s3238_s3, 1024, %s2360_s21, [#allocation9], %s2320_s30, %s2320_s30, %s2321_s6  }
  0x24   :  { %s2322_s18 = smov [#allocation2]   ;;  %s2323_s20 = smov [#allocation7]  }
  0x25   :  { %s19_s19 = sshll.u32 %s2322_s18, 4  ;;  %s44_s22 = sshll.u32 %s2323_s20, 4  ;;  %s20_s19 = int_to_ptr.vmem [resolvable:$true] %s19_s19  ;;  %s45_s22 = int_to_ptr.vmem [resolvable:$true] %s44_s22 }
  0x26   :  { %s2222_s25 = scalar_lea.hbm %s3235_s0, 8192 }
  0x27   :  { %p2223_p2 = scmp.ne.s32.totalorder %s3235_s0, %s2222_s25  ;;  %p2226_p3 = scmp.lt.u32.totalorder %s2222_s25, %s3235_s0 }
  0x29   :  { %p2228_p4 = pnand %p2226_p3, %p2223_p2 }
  0x2b   :  { %2231 = shalt.err (!%p2228_p4)
}
  0x2c   :  { %s2232_s3 = scalar_lea.vmem %s20_s19, 8192  ;;  %p2237_p6 = scmp.lt.s32.totalorder %s20_s19, %s20_s19 }
  0x2d   :  { %p2233_p5 = scmp.ne.s32.totalorder %s20_s19, %s2232_s3  ;;  %p2238_p7 = scmp.lt.s32.totalorder %s2232_s3, %s2232_s3 }
  0x2f   :  { %p2239_p8 = por %p2238_p7, %p2237_p6 }
  0x31   :  { %p2240_p9 = pnand %p2239_p8, %p2233_p5 }
  0x33   :  { %2243 = shalt.err (!%p2240_p9)
}
  0x34   :  { %25 = dma.hbm_to_vmem [thread:$0]  %s3235_s0, 8192, %s20_s19, [#allocation3], %s2320_s30, %s2320_s30, %s2321_s6  }
  0x35   :  { %s2244_s10 = scalar_lea.hbm %s3237_s2, 64 }
  0x36   :  { %p2245_p10 = scmp.ne.s32.totalorder %s3237_s2, %s2244_s10  ;;  %p2248_p11 = scmp.lt.u32.totalorder %s2244_s10, %s3237_s2 }
  0x38   :  { %p2250_p12 = pnand %p2248_p11, %p2245_p10 }
  0x3a   :  { %2253 = shalt.err (!%p2250_p12)
}
  0x3b   :  { %s2254_s15 = scalar_lea.vmem %s45_s22, 64  ;;  %p2259_p0 = scmp.lt.s32.totalorder %s45_s22, %s45_s22 }
  0x3c   :  { %p2255_p13 = scmp.ne.s32.totalorder %s45_s22, %s2254_s15  ;;  %p2260_p1 = scmp.lt.s32.totalorder %s2254_s15, %s2254_s15 }
  0x3e   :  { %p2261_p2 = por %p2260_p1, %p2259_p0 }
  0x40   :  { %p2262_p3 = pnand %p2261_p2, %p2255_p13 }
  0x42   :  { %2265 = shalt.err (!%p2262_p3)
}
  0x43   :  { %47 = dma.hbm_to_vmem [thread:$0]  %s3237_s2, 64, %s45_s22, [#allocation6]  }
  0x44   :  { %s2324_s6 = smov [#allocation10]   ;;  %s2266_s18 = scalar_lea.hbm %s3239_s4, 16 }
  0x45   :  { %s66_s16 = sshll.u32 %s2324_s6, 4  ;;  %p2267_p4 = scmp.ne.s32.totalorder %s3239_s4, %s2266_s18  ;;  %s67_s16 = int_to_ptr.vmem [resolvable:$true] %s66_s16 }
  0x46   :  { %p2270_p5 = scmp.lt.u32.totalorder %s2266_s18, %s3239_s4 }
  0x48   :  { %p2272_p6 = pnand %p2270_p5, %p2267_p4 }
  0x4a   :  { %2275 = shalt.err (!%p2272_p6)
}
  0x4b   :  { %s2276_s25 = scalar_lea.vmem %s67_s16, 16  ;;  %s2280_s2 = scalar_lea.vmem %s67_s16, 32 }
  0x4c   :  { %p2277_p7 = scmp.ne.s32.totalorder %s67_s16, %s2276_s25  ;;  %p2281_p8 = scmp.lt.s32.totalorder %s67_s16, %s67_s16 }
  0x4d   :  { %p2282_p9 = scmp.lt.s32.totalorder %s2280_s2, %s2276_s25 }
  0x4f   :  { %p2283_p10 = por %p2282_p9, %p2281_p8 }
  0x51   :  { %p2284_p11 = pnand %p2283_p10, %p2277_p7 }
  0x53   :  { %2287 = shalt.err (!%p2284_p11)
}
  0x54   :  { %69 = dma.hbm_to_vmem [thread:$0]  %s3239_s4, 16, %s67_s16, [#allocation9]  }
  0x55   :  { %2310 = dma.done.wait [#allocation3], 8192  }
  0x56   :  { %2311 = vsyncadd [#allocation3], 4294959104 }
  0x57   :  { %2312 = dma.done.wait [#allocation6], 1088  }
  0x58   :  { %2313 = vsyncadd [#allocation6], 4294966208 }
  0x59   :  { %2314 = dma.done.wait [#allocation9], 1040  }
  0x5a   :  { %2315 = vsyncadd [#allocation9], 4294966256  ;;  %vm149_vm0 = vcmask 523264   ;;  %v93_v0 = vld [vmem:[#allocation2 + $0x40] sm:$0xff]  ;;  %v94_v2 = vld [vmem:[#allocation2 + $0x48] sm:$0xff]  ;;  %vm2326_vm1 = vmmov 0  }
  0x5b   :  { %v85_v1 = vld [vmem:[#allocation2] sm:$0xff]  ;;  %v174_v3 = vsel %vm149_vm0, %v93_v0, 0.0  ;;  %v86_v5 = vld [vmem:[#allocation2 + $0x8] sm:$0xff]  ;;  %v177_v6 = vsel %vm149_vm0, %v94_v2, 0.0  ;;  %v95_v8 = vld [vmem:[#allocation2 + $0x50] sm:$0xff]  ;;  %vm489_vm2 = vcmask 130112  }
  0x5c   :  { %v150_v4 = vsel %vm149_vm0, %v85_v1, 0.0  ;;  %175 = vadd.xlane.f32.xlu1 %v174_v3  ;;  %v153_v7 = vsel %vm149_vm0, %v86_v5, 0.0  ;;  %v87_v9 = vld [vmem:[#allocation2 + $0x10] sm:$0xff]  ;;  %v180_v10 = vsel %vm149_vm0, %v95_v8, 0.0  ;;  %v102_v12 = vld [vmem:[#allocation2 + $0x88] sm:$0xff]  ;;  %v101_v13 = vld [vmem:[#allocation2 + $0x80] sm:$0xff] }
  0x5d   :  { %151 = vadd.xlane.f32.xlu0 %v150_v4  ;;  %v156_v11 = vsel %vm149_vm0, %v87_v9, 0.0  ;;  %v201_v14 = vsel %vm149_vm0, %v102_v12, 0.0  ;;  %v198_v15 = vsel %vm149_vm0, %v101_v13, 0.0  ;;  %v96_v16 = vld [vmem:[#allocation2 + $0x58] sm:$0xff]  ;;  %v109_v20 = vld [vmem:[#allocation2 + $0xc0] sm:$0xff]  ;;  %v103_v21 = vld [vmem:[#allocation2 + $0x90] sm:$0xff] }
  0x5e   :  { %v88_v17 = vld [vmem:[#allocation2 + $0x18] sm:$0xff]  ;;  %v183_v18 = vsel %vm149_vm0, %v96_v16, 0.0  ;;  %v222_v22 = vsel %vm149_vm0, %v109_v20, 0.0  ;;  %v204_v23 = vsel %vm149_vm0, %v103_v21, 0.0  ;;  %v89_v24 = vld [vmem:[#allocation2 + $0x20] sm:$0xff]  ;;  %v110_v25 = vld [vmem:[#allocation2 + $0xc8] sm:$0xff] }
  0x5f   :  { %v159_v19 = vsel %vm149_vm0, %v88_v17, 0.0  ;;  %v162_v26 = vsel %vm149_vm0, %v89_v24, 0.0  ;;  %v225_v27 = vsel %vm149_vm0, %v110_v25, 0.0  ;;  %v104_v28 = vld [vmem:[#allocation2 + $0x98] sm:$0xff]  ;;  %v97_v29 = vld [vmem:[#allocation2 + $0x60] sm:$0xff]  ;;  %v111_v33 = vld [vmem:[#allocation2 + $0xd0] sm:$0xff] }
  0x60   :  { %178 = vadd.xlane.f32.xlu1 %v177_v6  ;;  %v207_v30 = vsel %vm149_vm0, %v104_v28, 0.0  ;;  %v186_v31 = vsel %vm149_vm0, %v97_v29, 0.0  ;;  %v117_v32 = vld [vmem:[#allocation2 + $0x100] sm:$0xff]  ;;  %v228_v35 = vsel %vm149_vm0, %v111_v33, 0.0  ;;  %v90_v36 = vld [vmem:[#allocation2 + $0x28] sm:$0xff]  ;;  %v119_v44 = vld [vmem:[#allocation2 + $0x110] sm:$0xff] }
  0x61   :  { %154 = vadd.xlane.f32.xlu0 %v153_v7  ;;  %v246_v34 = vsel %vm149_vm0, %v117_v32, 0.0  ;;  %v118_v37 = vld [vmem:[#allocation2 + $0x108] sm:$0xff]  ;;  %v165_v38 = vsel %vm149_vm0, %v90_v36, 0.0  ;;  %v105_v40 = vld [vmem:[#allocation2 + $0xa0] sm:$0xff]  ;;  %v112_v45 = vld [vmem:[#allocation2 + $0xd8] sm:$0xff]  ;;  %v252_v46 = vsel %vm149_vm0, %v119_v44, 0.0 }
  0x62   :  { %v249_v39 = vsel %vm149_vm0, %v118_v37, 0.0  ;;  %v98_v41 = vld [vmem:[#allocation2 + $0x68] sm:$0xff]  ;;  %v210_v42 = vsel %vm149_vm0, %v105_v40, 0.0  ;;  %v231_v47 = vsel %vm149_vm0, %v112_v45, 0.0  ;;  %v125_v49 = vld [vmem:[#allocation2 + $0x140] sm:$0xff]  ;;  %v99_v52 = vld [vmem:[#allocation2 + $0x70] sm:$0xff] }
  0x63   :  { %v189_v43 = vsel %vm149_vm0, %v98_v41, 0.0  ;;  %v126_v48 = vld [vmem:[#allocation2 + $0x148] sm:$0xff]  ;;  %v270_v51 = vsel %vm149_vm0, %v125_v49, 0.0  ;;  %v91_v53 = vld [vmem:[#allocation2 + $0x30] sm:$0xff]  ;;  %v192_v54 = vsel %vm149_vm0, %v99_v52, 0.0  ;;  %v113_v56 = vld [vmem:[#allocation2 + $0xe0] sm:$0xff] }
  0x64   :  { %181 = vadd.xlane.f32.xlu1 %v180_v10  ;;  %v273_v50 = vsel %vm149_vm0, %v126_v48, 0.0  ;;  %v168_v55 = vsel %vm149_vm0, %v91_v53, 0.0  ;;  %v106_v57 = vld [vmem:[#allocation2 + $0xa8] sm:$0xff]  ;;  %v234_v58 = vsel %vm149_vm0, %v113_v56, 0.0  ;;  %v127_v60 = vld [vmem:[#allocation2 + $0x150] sm:$0xff]  ;;  %v120_v61 = vld [vmem:[#allocation2 + $0x118] sm:$0xff] }
  0x65   :  { %157 = vadd.xlane.f32.xlu0 %v156_v11  ;;  %v213_v59 = vsel %vm149_vm0, %v106_v57, 0.0  ;;  %v276_v62 = vsel %vm149_vm0, %v127_v60, 0.0  ;;  %v255_v63 = vsel %vm149_vm0, %v120_v61, 0.0  ;;  %v134_v0 = vld [vmem:[#allocation2 + $0x188] sm:$0xff]  ;;  %v133_v1 = vld [vmem:[#allocation2 + $0x180] sm:$0xff]  ;;  %v100_v4 = vld [vmem:[#allocation2 + $0x78] sm:$0xff] }
  0x66   :  { %v297_v2 = vsel %vm149_vm0, %v134_v0, 0.0  ;;  %v294_v3 = vsel %vm149_vm0, %v133_v1, 0.0  ;;  %v92_v5 = vld [vmem:[#allocation2 + $0x38] sm:$0xff]  ;;  %v195_v6 = vsel %vm149_vm0, %v100_v4, 0.0  ;;  %v114_v8 = vld [vmem:[#allocation2 + $0xe8] sm:$0xff]  ;;  %v107_v9 = vld [vmem:[#allocation2 + $0xb0] sm:$0xff] }
  0x67   :  { %v171_v7 = vsel %vm149_vm0, %v92_v5, 0.0  ;;  %v237_v10 = vsel %vm149_vm0, %v114_v8, 0.0  ;;  %v216_v11 = vsel %vm149_vm0, %v107_v9, 0.0  ;;  %v128_v12 = vld [vmem:[#allocation2 + $0x158] sm:$0xff]  ;;  %v121_v13 = vld [vmem:[#allocation2 + $0x120] sm:$0xff]  ;;  %v135_v17 = vld [vmem:[#allocation2 + $0x190] sm:$0xff] }
  0x68   :  { %202 = vadd.xlane.f32.xlu1 %v201_v14  ;;  %v279_v14 = vsel %vm149_vm0, %v128_v12, 0.0  ;;  %v141_v16 = vld [vmem:[#allocation2 + $0x1c0] sm:$0xff]  ;;  %v108_v20 = vld [vmem:[#allocation2 + $0xb8] sm:$0xff]  ;;  %v142_v21 = vld [vmem:[#allocation2 + $0x1c8] sm:$0xff]  ;;  %vm496_vm3 = vcmask 195712   ;;  %vm503_vm4 = vcmask 261312  }
  0x69   :  { %199 = vadd.xlane.f32.xlu0 %v198_v15  ;;  %v258_v15 = vsel %vm149_vm0, %v121_v13, 0.0  ;;  %v122_v24 = vld [vmem:[#allocation2 + $0x128] sm:$0xff]  ;;  %v115_v25 = vld [vmem:[#allocation2 + $0xf0] sm:$0xff]  ;;  %v136_v28 = vld [vmem:[#allocation2 + $0x198] sm:$0xff]  ;;  %vm510_vm5 = vcmask 326912   ;;  %vm517_vm6 = vcmask 392512  }
  0x6a   :  { %v129_v29 = vld [vmem:[#allocation2 + $0x160] sm:$0xff]  ;;  %v116_v32 = vld [vmem:[#allocation2 + $0xf8] sm:$0xff]  ;;  %v143_v33 = vld [vmem:[#allocation2 + $0x1d0] sm:$0xff]  ;;  %vm524_vm7 = vcmask 458112   ;;  %vm531_vm8 = vcmask 523712   ;;  %vm806_vm9 = vcmask 1041409  }
  0x6b   :  { %v130_v36 = vld [vmem:[#allocation2 + $0x168] sm:$0xff]  ;;  %v123_v37 = vld [vmem:[#allocation2 + $0x130] sm:$0xff]  ;;  %v144_v40 = vld [vmem:[#allocation2 + $0x1d8] sm:$0xff]  ;;  %vm808_vm10 = vcmask 1042434   ;;  %vm3283_vm11 = vcmask 1043459   ;;  %vm3284_vm12 = vcmask 1044484  }
  0x6c   :  { %184 = vadd.xlane.f32.xlu1 %v183_v18  ;;  %v318_v18 = vsel %vm149_vm0, %v141_v16, 0.0  ;;  %v137_v41 = vld [vmem:[#allocation2 + $0x1a0] sm:$0xff]  ;;  %v131_v44 = vld [vmem:[#allocation2 + $0x170] sm:$0xff]  ;;  %v124_v45 = vld [vmem:[#allocation2 + $0x138] sm:$0xff]  ;;  %vm814_vm13 = vcmask 1045509   ;;  %vm816_vm14 = vcmask 1046534  }
  0x6d   :  { %160 = vadd.xlane.f32.xlu0 %v159_v19  ;;  %v300_v19 = vsel %vm149_vm0, %v135_v17, 0.0  ;;  %v145_v48 = vld [vmem:[#allocation2 + $0x1e0] sm:$0xff]  ;;  %v138_v49 = vld [vmem:[#allocation2 + $0x1a8] sm:$0xff]  ;;  %v139_v52 = vld [vmem:[#allocation2 + $0x1b0] sm:$0xff]  ;;  %vm818_vm15 = vcmask 1047559   ;;  %s2329_s4 = smov [#allocation11]  }
  0x6e   :  { %v132_v53 = vld [vmem:[#allocation2 + $0x178] sm:$0xff]  ;;  %v146_v57 = vld [vmem:[#allocation2 + $0x1e8] sm:$0xff]  ;;  %v147_v60 = vld [vmem:[#allocation2 + $0x1f0] sm:$0xff]  ;;  %s2056_s27 = sshll.u32 %s2329_s4, 4  ;;  %s2057_s27 = int_to_ptr.vmem [resolvable:$true] %s2056_s27 }
  0x6f   :  { %v140_v56 = vld [vmem:[#allocation2 + $0x1b8] sm:$0xff]  ;;  %v406_v0 = vld [vmem:[#allocation5] sm:$0xff]  ;;  %v407_v1 = vld [vmem:[#allocation5 + $0x8] sm:$0xff]  ;;  %s2288_s28 = scalar_lea.vmem %s2057_s27, 128  ;;  %p2293_p13 = scmp.lt.s32.totalorder %s2057_s27, %s2057_s27 }
  0x70   :  { %223 = vadd.xlane.f32.xlu1 %v222_v22  ;;  %v219_v22 = vsel %vm149_vm0, %v108_v20, 0.0  ;;  %v148_v61 = vld [vmem:[#allocation2 + $0x1f8] sm:$0xff]  ;;  %v408_v4 = vld [vmem:[#allocation5 + $0x10] sm:$0xff]  ;;  %v411_v8 = vld [vmem:[#allocation5 + $0x28] sm:$0xff]  ;;  %p2289_p12 = scmp.ne.s32.totalorder %s2057_s27, %s2288_s28  ;;  %p2294_p0 = scmp.lt.s32.totalorder %s2288_s28, %s2288_s28 }
  0x71   :  { %205 = vadd.xlane.f32.xlu0 %v204_v23  ;;  %v321_v23 = vsel %vm149_vm0, %v142_v21, 0.0  ;;  %v409_v5 = vld [vmem:[#allocation5 + $0x18] sm:$0xff] }
  0x72   :  { %p2295_p1 = por %p2294_p0, %p2293_p13 }
  0x74   :  { %163 = vadd.xlane.f32.xlu1 %v162_v26  ;;  %v261_v26 = vsel %vm149_vm0, %v122_v24, 0.0  ;;  %p2296_p2 = pnand %p2295_p1, %p2289_p12 }
  0x75   :  { %226 = vadd.xlane.f32.xlu0 %v225_v27  ;;  %v240_v27 = vsel %vm149_vm0, %v115_v25, 0.0 }
  0x78   :  { %208 = vadd.xlane.f32.xlu1 %v207_v30  ;;  %v303_v30 = vsel %vm149_vm0, %v136_v28, 0.0 }
  0x79   :  { %187 = vadd.xlane.f32.xlu0 %v186_v31  ;;  %v282_v31 = vsel %vm149_vm0, %v129_v29, 0.0 }
  0x7c   :  { %247 = vadd.xlane.f32.xlu1 %v246_v34  ;;  %v243_v34 = vsel %vm149_vm0, %v116_v32, 0.0 }
  0x7d   :  { %229 = vadd.xlane.f32.xlu0 %v228_v35  ;;  %v324_v35 = vsel %vm149_vm0, %v143_v33, 0.0 }
  0x80   :  { %166 = vadd.xlane.f32.xlu1 %v165_v38  ;;  %v285_v38 = vsel %vm149_vm0, %v130_v36, 0.0 }
  0x81   :  { %250 = vadd.xlane.f32.xlu0 %v249_v39  ;;  %v264_v39 = vsel %vm149_vm0, %v123_v37, 0.0 }
  0x84   :  { %211 = vadd.xlane.f32.xlu1 %v210_v42  ;;  %v327_v42 = vsel %vm149_vm0, %v144_v40, 0.0 }
  0x85   :  { %190 = vadd.xlane.f32.xlu0 %v189_v43  ;;  %v306_v43 = vsel %vm149_vm0, %v137_v41, 0.0 }
  0x88   :  { %253 = vadd.xlane.f32.xlu1 %v252_v46  ;;  %v288_v46 = vsel %vm149_vm0, %v131_v44, 0.0 }
  0x89   :  { %232 = vadd.xlane.f32.xlu0 %v231_v47  ;;  %v267_v47 = vsel %vm149_vm0, %v124_v45, 0.0 }
  0x8c   :  { %274 = vadd.xlane.f32.xlu1 %v273_v50  ;;  %v330_v50 = vsel %vm149_vm0, %v145_v48, 0.0  ;;  %v478_v48 = vlaneseq }
  0x8d   :  { %271 = vadd.xlane.f32.xlu0 %v270_v51  ;;  %v309_v51 = vsel %vm149_vm0, %v138_v49, 0.0 }
  0x90   :  { %193 = vadd.xlane.f32.xlu1 %v192_v54  ;;  %v312_v54 = vsel %vm149_vm0, %v139_v52, 0.0 }
  0x91   :  { %169 = vadd.xlane.f32.xlu0 %v168_v55  ;;  %v291_v55 = vsel %vm149_vm0, %v132_v53, 0.0 }
  0x94   :  { %235 = vadd.xlane.f32.xlu1 %v234_v58  ;;  %v315_v58 = vsel %vm149_vm0, %v140_v56, 0.0 }
  0x95   :  { %214 = vadd.xlane.f32.xlu0 %v213_v59  ;;  %v333_v59 = vsel %vm149_vm0, %v146_v57, 0.0 }
  0x98   :  { %277 = vadd.xlane.f32.xlu1 %v276_v62  ;;  %v336_v62 = vsel %vm149_vm0, %v147_v60, 0.0 }
  0x99   :  { %256 = vadd.xlane.f32.xlu0 %v255_v63  ;;  %v339_v63 = vsel %vm149_vm0, %v148_v61, 0.0 }
  0x9c   :  { %298 = vadd.xlane.f32.xlu1 %v297_v2  ;;  %v2137_v2 = vpack.c.bf16 %v407_v1, %v406_v0 }
  0x9d   :  { %295 = vadd.xlane.f32.xlu0 %v294_v3  ;;  %v3242_v3 = vmov 0.0|0.0  }
  0x9e   :  { %2136 = vmatprep.subr.bf16.mxu0 %v3242_v3 }
  0x9f   :  { %2138 = vmatpush3.bf16.msra.mxu0 %v2137_v2 }
  0xa0   :  { %196 = vadd.xlane.f32.xlu1 %v195_v6  ;;  %2139 = vmatprep.subr.bf16.mxu0 %v3242_v3  ;;  %v2140_v6 = vpack.c.bf16 %v409_v5, %v408_v4 }
  0xa1   :  { %172 = vadd.xlane.f32.xlu0 %v171_v7  ;;  %v410_v7 = vld [vmem:[#allocation5 + $0x20] sm:$0xff] }
  0xa2   :  { %v2143_v9 = vpack.c.bf16 %v411_v8, %v410_v7 }
  0xa3   :  { %2141 = vmatpush3.bf16.msra.mxu0 %v2140_v6 }
  0xa4   :  { %238 = vadd.xlane.f32.xlu1 %v237_v10  ;;  %2142 = vmatprep.subr.bf16.mxu0 %v3242_v3  ;;  %v412_v10 = vld [vmem:[#allocation5 + $0x30] sm:$0xff] }
  0xa5   :  { %217 = vadd.xlane.f32.xlu0 %v216_v11  ;;  %v413_v11 = vld [vmem:[#allocation5 + $0x38] sm:$0xff] }
  0xa6   :  { %v2146_v12 = vpack.c.bf16 %v413_v11, %v412_v10 }
  0xa7   :  { %2144 = vmatpush3.bf16.msra.mxu0 %v2143_v9 }
  0xa8   :  { %280 = vadd.xlane.f32.xlu1 %v279_v14  ;;  %2145 = vmatprep.subr.bf16.mxu0 %v3242_v3 }
  0xa9   :  { %259 = vadd.xlane.f32.xlu0 %v258_v15  ;;  %v3241_v15 = vmov 0.0  }
  0xaa   :  { %2109 = vmatprep.mubr.msk.f32.mxu0 %vm2326_vm1, %v3241_v15  ;;  %2112 = vmatprep.subr.mxu1 %v3241_v15 }
  0xab   :  { %2147 = vmatpush3.bf16.msra.mxu0 %v2146_v12  ;;  %2114 = vmatprep.mubr.msk.f32.mxu1 %vm2326_vm1, %v3241_v15 }
  0xac   :  { %319 = vadd.xlane.f32.xlu1 %v318_v18 }
  0xad   :  { %301 = vadd.xlane.f32.xlu0 %v300_v19 }
  0xb0   :  { %220 = vadd.xlane.f32.xlu1 %v219_v22 }
  0xb1   :  { %322 = vadd.xlane.f32.xlu0 %v321_v23 }
  0xb4   :  { %262 = vadd.xlane.f32.xlu1 %v261_v26 }
  0xb5   :  { %241 = vadd.xlane.f32.xlu0 %v240_v27 }
  0xb8   :  { %304 = vadd.xlane.f32.xlu1 %v303_v30 }
  0xb9   :  { %283 = vadd.xlane.f32.xlu0 %v282_v31 }
  0xbc   :  { %244 = vadd.xlane.f32.xlu1 %v243_v34 }
  0xbd   :  { %325 = vadd.xlane.f32.xlu0 %v324_v35 }
  0xc0   :  { %286 = vadd.xlane.f32.xlu1 %v285_v38 }
  0xc1   :  { %265 = vadd.xlane.f32.xlu0 %v264_v39 }
  0xc4   :  { %328 = vadd.xlane.f32.xlu1 %v327_v42 }
  0xc5   :  { %307 = vadd.xlane.f32.xlu0 %v306_v43 }
  0xc8   :  { %289 = vadd.xlane.f32.xlu1 %v288_v46 }
  0xc9   :  { %268 = vadd.xlane.f32.xlu0 %v267_v47 }
  0xcc   :  { %331 = vadd.xlane.f32.xlu1 %v330_v50 }
  0xcd   :  { %310 = vadd.xlane.f32.xlu0 %v309_v51  ;;  %v479_v51 = vand.u32 127, %v478_v48 }
  0xcf   :  { %v491_v56 = vadd.s32 4294967280, %v479_v51  ;;  %v498_v57 = vadd.s32 4294967272, %v479_v51  ;;  %v505_v60 = vadd.s32 4294967264, %v479_v51 }
  0xd0   :  { %313 = vadd.xlane.f32.xlu1 %v312_v54  ;;  %v2565_v54 = vshrl.u32 %v478_v48, 7 }
  0xd1   :  { %292 = vadd.xlane.f32.xlu0 %v291_v55  ;;  %v484_v55 = vadd.s32 4294967288, %v479_v51 }
  0xd2   :  { %v2572_v61 = vsub.s32 %v479_v51, %v2565_v54  ;;  %v2582_v1 = vsub.s32 %v491_v56, %v2565_v54  ;;  %v2591_v6 = vsub.s32 %v498_v57, %v2565_v54  ;;  %v2602_v11 = vsub.s32 %v505_v60, %v2565_v54 }
  0xd4   :  { %316 = vadd.xlane.f32.xlu1 %v315_v58  ;;  %3285 = vst [vmem:[#allocation16_spill] sm:$0xff] %v2572_v61  ;;  %3288 = vst [vmem:[#allocation19_spill] sm:$0xff] %v2582_v1 }
  0xd5   :  { %334 = vadd.xlane.f32.xlu0 %v333_v59  ;;  %3291 = vst [vmem:[#allocation22_spill] sm:$0xff] %v2591_v6  ;;  %3294 = vst [vmem:[#allocation25_spill] sm:$0xff] %v2602_v11 }
  0xd8   :  { %340 = vadd.xlane.f32.xlu1 %v339_v63 }
  0xd9   :  { %337 = vadd.xlane.f32.xlu0 %v336_v62  ;;  %v2575_v62 = vsub.s32 %v484_v55, %v2565_v54 }
  0xdb   :  { %3286 = vst [vmem:[#allocation17_spill] sm:$0xff] %v2575_v62 }
  0xe9   :  { %v176_v13 = vpop.xlane.xlu1 %175 }
  0xea   :  { %v152_v14 = vpop.xlane.xlu0 %151  ;;  %v2577_v63 = vmul.f32 0.015625, %v176_v13 }
  0xeb   :  { %v2579_v0 = vmul.f32 0.015625, %v152_v14 }
  0xec   :  { %3287 = vst [vmem:[#allocation18_spill] sm:$0xff] %v2577_v63 }
  0xed   :  { %v179_v16 = vpop.xlane.xlu1 %178 }
  0xee   :  { %v155_v17 = vpop.xlane.xlu0 %154  ;;  %v2584_v2 = vmul.f32 0.015625, %v179_v16  ;;  %v512_v16 = vadd.s32 4294967256, %v479_v51 }
  0xef   :  { %v2586_v4 = vmul.f32 0.015625, %v155_v17  ;;  %v536_v17 = vrot.slane %v2577_v63, %v2572_v61 }
  0xf0   :  { %3289 = vst [vmem:[#allocation20_spill] sm:$0xff] %v2584_v2  ;;  %v540_v48 = vrot.slane %v2584_v2, %v2575_v62 }
  0xf1   :  { %v182_v18 = vpop.xlane.xlu1 %181 }
  0xf2   :  { %v158_v19 = vpop.xlane.xlu0 %157  ;;  %v2588_v5 = vmul.f32 0.015625, %v182_v18  ;;  %v483_v18 = vrot.slane %v2579_v0, %v2572_v61 }
  0xf3   :  { %v2597_v9 = vmul.f32 0.015625, %v158_v19  ;;  %v519_v19 = vadd.s32 4294967248, %v479_v51 }
  0xf4   :  { %3290 = vst [vmem:[#allocation21_spill] sm:$0xff] %v2588_v5 }
  0xf5   :  { %v203_v20 = vpop.xlane.xlu1 %202  ;;  %3292 = vst [vmem:[#allocation23_spill] sm:$0xff] %v2597_v9  ;;  %v495_v57 = vrot.slane %v2597_v9, %v2582_v1 }
  0xf6   :  { %v200_v21 = vpop.xlane.xlu0 %199  ;;  %v2599_v10 = vmul.f32 0.015625, %v203_v20  ;;  %v526_v20 = vadd.s32 4294967240, %v479_v51 }
  0xf7   :  { %v2604_v12 = vmul.f32 0.015625, %v200_v21  ;;  %v488_v21 = vrot.slane %v2586_v4, %v2575_v62 }
  0xf8   :  { %3293 = vst [vmem:[#allocation24_spill] sm:$0xff] %v2599_v10  ;;  %v579_v51 = vrot.slane %v2599_v10, %v2575_v62  ;;  %v2647_v10 = vsub.s32 %v512_v16, %v2565_v54 }
  0xf9   :  { %v185_v22 = vpop.xlane.xlu1 %184  ;;  %3295 = vst [vmem:[#allocation26_spill] sm:$0xff] %v2604_v12 }
  0xfa   :  { %v161_v23 = vpop.xlane.xlu0 %160  ;;  %v2606_v13 = vmul.f32 0.015625, %v185_v22  ;;  %v545_v22 = vrot.slane %v2588_v5, %v2582_v1 }
  0xfb   :  { %v2608_v14 = vmul.f32 0.015625, %v161_v23 }
  0xfc   :  { %3296 = vst [vmem:[#allocation27_spill] sm:$0xff] %v2606_v13  ;;  %v550_v3 = vrot.slane %v2606_v13, %v2591_v6  ;;  %v490_v13 = vsel %vm489_vm2, %v488_v21, %v483_v18 }
  0xfd   :  { %v2509_v24 = vpop.xlane.xlu1 %223  ;;  %3297 = vst [vmem:[#allocation28_spill] sm:$0xff] %v2608_v14  ;;  %v502_v5 = vrot.slane %v2608_v14, %v2591_v6 }
  0xfe   :  { %v2511_v25 = vpop.xlane.xlu0 %205  ;;  %v2644_v9 = vmul.f32 0.015625, %v2509_v24 }
  0xff   :  { %v2621_v23 = vmul.f32 0.015625, %v2511_v25  ;;  %v575_v25 = vrot.slane %v2604_v12, %v2572_v61  ;;  %v541_v12 = vsel %vm489_vm2, %v540_v48, %v536_v17 }
 0x101   :  { %v2513_v26 = vpop.xlane.xlu1 %163  ;;  %3298 = vst [vmem:[#allocation29_spill] sm:$0xff] %v2621_v23  ;;  %v584_v14 = vrot.slane %v2621_v23, %v2582_v1  ;;  %v580_v48 = vsel %vm489_vm2, %v579_v51, %v575_v25  ;;  %v614_v23 = vrot.slane %v2644_v9, %v2572_v61 }
 0x102   :  { %v2515_v27 = vpop.xlane.xlu0 %226  ;;  %v2632_v60 = vmul.f32 0.015625, %v2513_v26  ;;  %v2650_v26 = vsub.s32 %v519_v19, %v2565_v54  ;;  %v546_v19 = vsel %vm496_vm3, %v545_v22, %v541_v12 }
 0x103   :  { %v2635_v15 = vmul.f32 0.015625, %v2515_v27  ;;  %v2653_v27 = vsub.s32 %v526_v20, %v2565_v54  ;;  %v497_v20 = vsel %vm496_vm3, %v495_v57, %v490_v13 }
 0x104   :  { %v509_v17 = vrot.slane %v2632_v60, %v2602_v11  ;;  %v504_v21 = vsel %vm503_vm4, %v502_v5, %v497_v20 }
 0x105   :  { %v2517_v28 = vpop.xlane.xlu1 %208  ;;  %v618_v18 = vrot.slane %v2635_v15, %v2575_v62 }
 0x106   :  { %v2519_v29 = vpop.xlane.xlu0 %187  ;;  %v2660_v24 = vmul.f32 0.015625, %v2517_v28  ;;  %v551_v28 = vsel %vm503_vm4, %v550_v3, %v546_v19  ;;  %v585_v3 = vsel %vm496_vm3, %v584_v14, %v580_v48 }
 0x107   :  { %v2678_v63 = vmul.f32 0.015625, %v2519_v29 }
 0x108   :  { %v589_v5 = vrot.slane %v2660_v24, %v2591_v6 }
 0x109   :  { %v2521_v30 = vpop.xlane.xlu1 %247 }
 0x10a   :  { %v2523_v31 = vpop.xlane.xlu0 %229  ;;  %v2693_v57 = vmul.f32 0.015625, %v2521_v30 }
 0x10b   :  { %v2681_v12 = vmul.f32 0.015625, %v2523_v31 }
 0x10c   :  { %3302 = vst [vmem:[#allocation33_spill] sm:$0xff] %v2693_v57 }
 0x10d   :  { %v2525_v32 = vpop.xlane.xlu1 %166  ;;  %3299 = vst [vmem:[#allocation30_spill] sm:$0xff] %v2681_v12 }
 0x10e   :  { %v2527_v33 = vpop.xlane.xlu0 %250  ;;  %v2684_v13 = vmul.f32 0.015625, %v2525_v32  ;;  %v511_v32 = vsel %vm510_vm5, %v509_v17, %v504_v21 }
 0x10f   :  { %v2687_v22 = vmul.f32 0.015625, %v2527_v33  ;;  %v619_v33 = vsel %vm489_vm2, %v618_v18, %v614_v23  ;;  %v555_v23 = vrot.slane %v2678_v63, %v2602_v11 }
 0x110   :  { %3300 = vst [vmem:[#allocation31_spill] sm:$0xff] %v2684_v13 }
 0x111   :  { %v2529_v34 = vpop.xlane.xlu1 %211  ;;  %3301 = vst [vmem:[#allocation32_spill] sm:$0xff] %v2687_v22 }
 0x112   :  { %v2531_v35 = vpop.xlane.xlu0 %190  ;;  %v2696_v29 = vmul.f32 0.015625, %v2529_v34 }
 0x113   :  { %v2705_v25 = vmul.f32 0.015625, %v2531_v35  ;;  %v623_v35 = vrot.slane %v2681_v12, %v2582_v1 }
 0x114   :  { %3303 = vst [vmem:[#allocation34_spill] sm:$0xff] %v2696_v29 }
 0x115   :  { %v2533_v36 = vpop.xlane.xlu1 %253  ;;  %3304 = vst [vmem:[#allocation35_spill] sm:$0xff] %v2705_v25  ;;  %v560_v21 = vrot.slane %v2705_v25, %v2647_v10 }
 0x116   :  { %v2535_v37 = vpop.xlane.xlu0 %232  ;;  %v2708_v14 = vmul.f32 0.015625, %v2533_v36  ;;  %v516_v36 = vrot.slane %v2684_v13, %v2647_v10 }
 0x117   :  { %v2711_v30 = vmul.f32 0.015625, %v2535_v37  ;;  %v657_v37 = vrot.slane %v2687_v22, %v2575_v62 }
 0x118   :  { %3305 = vst [vmem:[#allocation36_spill] sm:$0xff] %v2708_v14  ;;  %v662_v22 = vrot.slane %v2708_v14, %v2582_v1  ;;  %v556_v14 = vsel %vm510_vm5, %v555_v23, %v551_v28 }
 0x119   :  { %v2537_v38 = vpop.xlane.xlu1 %274  ;;  %3306 = vst [vmem:[#allocation37_spill] sm:$0xff] %v2711_v30 }
 0x11a   :  { %v2539_v39 = vpop.xlane.xlu0 %271  ;;  %v2714_v34 = vmul.f32 0.015625, %v2537_v38  ;;  %v590_v38 = vsel %vm503_vm4, %v589_v5, %v585_v3 }
 0x11b   :  { %v2717_v19 = vmul.f32 0.015625, %v2539_v39  ;;  %v653_v39 = vrot.slane %v2693_v57, %v2572_v61 }
 0x11c   :  { %3307 = vst [vmem:[#allocation38_spill] sm:$0xff] %v2714_v34 }
 0x11d   :  { %v2541_v40 = vpop.xlane.xlu1 %193  ;;  %3308 = vst [vmem:[#allocation39_spill] sm:$0xff] %v2717_v19  ;;  %v692_v12 = vrot.slane %v2717_v19, %v2572_v61  ;;  %v658_v13 = vsel %vm489_vm2, %v657_v37, %v653_v39 }
 0x11e   :  { %v2543_v41 = vpop.xlane.xlu0 %169  ;;  %v2720_v20 = vmul.f32 0.015625, %v2541_v40  ;;  %v594_v40 = vrot.slane %v2696_v29, %v2602_v11  ;;  %v696_v29 = vrot.slane %v2714_v34, %v2575_v62 }
 0x11f   :  { %v2736_v17 = vmul.f32 0.015625, %v2543_v41  ;;  %v628_v41 = vrot.slane %v2711_v30, %v2591_v6 }
 0x120   :  { %3309 = vst [vmem:[#allocation40_spill] sm:$0xff] %v2720_v20  ;;  %v565_v25 = vrot.slane %v2720_v20, %v2650_v26  ;;  %v595_v57 = vsel %vm510_vm5, %v594_v40, %v590_v38 }
 0x121   :  { %v2545_v42 = vpop.xlane.xlu1 %235  ;;  %v523_v30 = vrot.slane %v2736_v17, %v2650_v26 }
 0x122   :  { %v2547_v43 = vpop.xlane.xlu0 %214  ;;  %v2747_v3 = vmul.f32 0.015625, %v2545_v42  ;;  %v624_v42 = vsel %vm496_vm3, %v623_v35, %v619_v33  ;;  %v561_v33 = vsel %vm517_vm6, %v560_v21, %v556_v14 }
 0x123   :  { %v2750_v5 = vmul.f32 0.015625, %v2547_v43  ;;  %v518_v43 = vsel %vm517_vm6, %v516_v36, %v511_v32  ;;  %v663_v32 = vsel %vm496_vm3, %v662_v22, %v658_v13  ;;  %v566_v36 = vsel %vm524_vm7, %v565_v25, %v561_v33 }
 0x124   :  { %v633_v23 = vrot.slane %v2747_v3, %v2602_v11  ;;  %v525_v39 = vsel %vm524_vm7, %v523_v30, %v518_v43 }
 0x125   :  { %v2549_v44 = vpop.xlane.xlu1 %277  ;;  %v599_v35 = vrot.slane %v2750_v5, %v2647_v10 }
 0x126   :  { %v2551_v45 = vpop.xlane.xlu0 %256  ;;  %v2787_v37 = vmul.f32 0.015625, %v2549_v44 }
 0x127   :  { %v2790_v14 = vmul.f32 0.015625, %v2551_v45 }
 0x128   :  { %v701_v40 = vrot.slane %v2787_v37, %v2582_v1 }
 0x129   :  { %v2553_v46 = vpop.xlane.xlu1 %298 }
 0x12a   :  { %v2555_v47 = vpop.xlane.xlu0 %295  ;;  %v2793_v13 = vmul.f32 0.015625, %v2553_v46 }
 0x12b   :  { %v2796_v22 = vmul.f32 0.015625, %v2555_v47 }
 0x12d   :  { %v2557_v49 = vpop.xlane.xlu1 %196 }
 0x12e   :  { %v2559_v50 = vpop.xlane.xlu0 %172  ;;  %v2768_v34 = vmul.f32 0.015625, %v2557_v49  ;;  %v629_v49 = vsel %vm503_vm4, %v628_v41, %v624_v42 }
 0x12f   :  { %v2771_v19 = vmul.f32 0.015625, %v2559_v50  ;;  %v697_v50 = vsel %vm489_vm2, %v696_v29, %v692_v12  ;;  %v634_v47 = vsel %vm510_vm5, %v633_v23, %v629_v49 }
 0x130   :  { %v570_v12 = vrot.slane %v2768_v34, %v2653_v27 }
 0x131   :  { %v2561_v52 = vpop.xlane.xlu1 %238  ;;  %v530_v44 = vrot.slane %v2771_v19, %v2653_v27 }
 0x132   :  { %v2563_v53 = vpop.xlane.xlu0 %217  ;;  %v2814_v25 = vmul.f32 0.015625, %v2561_v52  ;;  %v735_v52 = vrot.slane %v2793_v13, %v2575_v62 }
 0x133   :  { %v2799_v38 = vmul.f32 0.015625, %v2563_v53  ;;  %v600_v53 = vsel %vm517_vm6, %v599_v35, %v595_v57  ;;  %v667_v57 = vrot.slane %v2790_v14, %v2591_v6 }
 0x134   :  { %v638_v35 = vrot.slane %v2814_v25, %v2647_v10 }
 0x135   :  { %v2567_v58 = vpop.xlane.xlu1 %280  ;;  %3310 = vst [vmem:[#allocation41_spill] sm:$0xff] %v2799_v38  ;;  %v604_v42 = vrot.slane %v2799_v38, %v2650_v26 }
 0x136   :  { %v2569_v59 = vpop.xlane.xlu0 %259  ;;  %v2817_v30 = vmul.f32 0.015625, %v2567_v58  ;;  %v731_v58 = vrot.slane %v2796_v22, %v2572_v61 }
 0x137   :  { %v2822_v21 = vmul.f32 0.015625, %v2569_v59  ;;  %v571_v59 = vsel %vm531_vm8, %v570_v12, %v566_v36 }
 0x138   :  { %3312 = vst [vmem:[#allocation43_spill] sm:$0xff] %v2817_v30  ;;  %v706_v49 = vrot.slane %v2817_v30, %v2591_v6  ;;  %v736_v30 = vsel %vm489_vm2, %v735_v52, %v731_v58 }
 0x139   :  { %v2593_v7 = vpop.xlane.xlu1 %319  ;;  %3313 = vst [vmem:[#allocation44_spill] sm:$0xff] %v2822_v21 }
 0x13a   :  { %v2595_v8 = vpop.xlane.xlu0 %301  ;;  %v2841_v43 = vmul.f32 0.015625, %v2593_v7  ;;  %v702_v7 = vsel %vm496_vm3, %v701_v40, %v697_v50 }
 0x13c   :  { %v770_v40 = vrot.slane %v2841_v43, %v2572_v61 }
 0x13d   :  { %v2623_v55 = vpop.xlane.xlu1 %220 }
 0x13e   :  { %v2625_v56 = vpop.xlane.xlu0 %322  ;;  %v2807_v45 = vmul.f32 0.015625, %v2623_v55  ;;  %v2825_v55 = vmul.f32 0.015625, %v2595_v8  ;;  %v532_v8 = vsel %vm531_vm8, %v530_v44, %v525_v39  ;;  %v672_v39 = vrot.slane %v2822_v21, %v2602_v11 }
 0x13f   :  { %v2828_v41 = vmul.f32 0.015625, %v2625_v56  ;;  %v807_v50 = vsel %vm806_vm9, %v571_v59, %v532_v8 }
 0x140   :  { %3311 = vst [vmem:[#allocation42_spill] sm:$0xff] %v2807_v45  ;;  %3314 = vst [vmem:[#allocation45_spill] sm:$0xff] %v2825_v55  ;;  %v609_v56 = vrot.slane %v2807_v45, %v2653_v27  ;;  %v740_v12 = vrot.slane %v2825_v55, %v2582_v1  ;;  %v668_v45 = vsel %vm503_vm4, %v667_v57, %v663_v32 }
 0x141   :  { %v2662_v2 = vpop.xlane.xlu1 %262  ;;  %3315 = vst [vmem:[#allocation46_spill] sm:$0xff] %v2828_v41  ;;  %v774_v44 = vrot.slane %v2828_v41, %v2575_v62  ;;  %v639_v32 = vsel %vm517_vm6, %v638_v35, %v634_v47  ;;  %v707_v57 = vsel %vm503_vm4, %v706_v49, %v702_v7  ;;  %v673_v52 = vsel %vm510_vm5, %v672_v39, %v668_v45 }
 0x142   :  { %v2664_v16 = vpop.xlane.xlu0 %241  ;;  %v2850_v38 = vmul.f32 0.015625, %v2662_v2  ;;  %v605_v2 = vsel %vm524_vm7, %v604_v42, %v600_v53  ;;  %v741_v58 = vsel %vm496_vm3, %v740_v12, %v736_v30 }
 0x143   :  { %v2853_v36 = vmul.f32 0.015625, %v2664_v16  ;;  %v610_v21 = vsel %vm531_vm8, %v609_v56, %v605_v2  ;;  %v775_v42 = vsel %vm489_vm2, %v774_v44, %v770_v40 }
 0x144   :  { %v809_v59 = vsel %vm808_vm10, %v610_v21, %v807_v50 }
 0x145   :  { %v2698_v31 = vpop.xlane.xlu1 %304  ;;  %v643_v53 = vrot.slane %v2853_v36, %v2650_v26 }
 0x146   :  { %v2700_v51 = vpop.xlane.xlu0 %283  ;;  %v2866_v16 = vmul.f32 0.015625, %v2698_v31  ;;  %v677_v31 = vrot.slane %v2850_v38, %v2647_v10 }
 0x147   :  { %v2873_v55 = vmul.f32 0.015625, %v2700_v51 }
 0x148   :  { %v745_v47 = vrot.slane %v2866_v16, %v2591_v6  ;;  %v678_v7 = vsel %vm517_vm6, %v677_v31, %v673_v52 }
 0x149   :  { %v2738_v18 = vpop.xlane.xlu1 %244  ;;  %v711_v45 = vrot.slane %v2873_v55, %v2602_v11 }
 0x14a   :  { %v2740_v48 = vpop.xlane.xlu0 %325  ;;  %v2885_v51 = vmul.f32 0.015625, %v2738_v18  ;;  %v746_v44 = vsel %vm503_vm4, %v745_v47, %v741_v58 }
 0x14b   :  { %v2891_v8 = vmul.f32 0.015625, %v2740_v48  ;;  %v644_v48 = vsel %vm524_vm7, %v643_v53, %v639_v32  ;;  %v712_v50 = vsel %vm510_vm5, %v711_v45, %v707_v57 }
 0x14c   :  { %v648_v12 = vrot.slane %v2885_v51, %v2653_v27 }
 0x14d   :  { %v2773_v20 = vpop.xlane.xlu1 %286 }
 0x14e   :  { %v2775_v28 = vpop.xlane.xlu0 %265  ;;  %v2894_v56 = vmul.f32 0.015625, %v2773_v20  ;;  %v649_v47 = vsel %vm531_vm8, %v648_v12, %v644_v48 }
 0x14f   :  { %v2899_v30 = vmul.f32 0.015625, %v2775_v28 }
 0x151   :  { %v2809_v46 = vpop.xlane.xlu1 %328 }
 0x152   :  { %v308_v29 = vpop.xlane.xlu0 %307  ;;  %v2914_v28 = vmul.f32 0.015625, %v2809_v46  ;;  %v682_v46 = vrot.slane %v2899_v30, %v2650_v26 }
 0x153   :  { %v2901_v18 = vmul.f32 0.015625, %v308_v29 }
 0x154   :  { %v784_v45 = vrot.slane %v2914_v28, %v2591_v6  ;;  %v683_v48 = vsel %vm524_vm7, %v682_v46, %v678_v7 }
 0x155   :  { %v290_v33 = vpop.xlane.xlu1 %289  ;;  %v750_v40 = vrot.slane %v2901_v18, %v2602_v11 }
 0x156   :  { %v269_v23 = vpop.xlane.xlu0 %268  ;;  %v2903_v35 = vmul.f32 0.015625, %v290_v33 }
 0x157   :  { %v2907_v39 = vmul.f32 0.015625, %v269_v23  ;;  %v779_v23 = vrot.slane %v2891_v8, %v2582_v1  ;;  %v751_v12 = vsel %vm510_vm5, %v750_v40, %v746_v44 }
 0x158   :  { %v721_v32 = vrot.slane %v2903_v35, %v2650_v26 }
 0x159   :  { %v332_v62 = vpop.xlane.xlu1 %331  ;;  %v687_v52 = vrot.slane %v2907_v39, %v2653_v27  ;;  %v780_v1 = vsel %vm496_vm3, %v779_v23, %v775_v42 }
 0x15a   :  { %v311_v41 = vpop.xlane.xlu0 %310  ;;  %v2925_v2 = vmul.f32 0.015625, %v332_v62  ;;  %v785_v7 = vsel %vm503_vm4, %v784_v45, %v780_v1  ;;  %v893_v45 = vld [vmem:[#allocation7] sm:$0xf] }
 0x15b   :  { %v2909_v20 = vmul.f32 0.015625, %v311_v41  ;;  %v716_v41 = vrot.slane %v2894_v56, %v2647_v10  ;;  %v688_v42 = vsel %vm531_vm8, %v687_v52, %v683_v48 }
 0x15d   :  { %v314_v21 = vpop.xlane.xlu1 %313  ;;  %3316 = vst [vmem:[#allocation47_spill] sm:$0xff] %v2909_v20  ;;  %v755_v62 = vrot.slane %v2909_v20, %v2647_v10  ;;  %v717_v61 = vsel %vm517_vm6, %v716_v41, %v712_v50 }
 0x15e   :  { %v293_v49 = vpop.xlane.xlu0 %292  ;;  %v2916_v29 = vmul.f32 0.015625, %v314_v21  ;;  %v722_v6 = vsel %vm524_vm7, %v721_v32, %v717_v61 }
 0x15f   :  { %v2918_v33 = vmul.f32 0.015625, %v293_v49  ;;  %v756_v23 = vsel %vm517_vm6, %v755_v62, %v751_v12 }
 0x160   :  { %3317 = vst [vmem:[#allocation48_spill] sm:$0xff] %v2916_v29  ;;  %v760_v21 = vrot.slane %v2916_v29, %v2650_v26 }
 0x161   :  { %3318 = vst [vmem:[#allocation49_spill] sm:$0xff] %v2918_v33  ;;  %v317_v31 = vpop.xlane.xlu1 %316  ;;  %v726_v49 = vrot.slane %v2918_v33, %v2653_v27 }
 0x162   :  { %v335_v53 = vpop.xlane.xlu0 %334  ;;  %v2938_v58 = vmul.f32 0.015625, %v317_v31  ;;  %v789_v31 = vrot.slane %v2925_v2, %v2602_v11  ;;  %v811_v11 = vsel %vm3283_vm11, %v649_v47, %v809_v59  ;;  %v761_v44 = vsel %vm524_vm7, %v760_v21, %v756_v23 }
 0x163   :  { %v2940_v57 = vmul.f32 0.015625, %v335_v53  ;;  %v727_v61 = vsel %vm531_vm8, %v726_v49, %v722_v6  ;;  %v813_v59 = vsel %vm3284_vm12, %v688_v42, %v811_v11  ;;  %vm898_vm11 = vcmask 1043456  }
 0x164   :  { %v765_v53 = vrot.slane %v2938_v58, %v2653_v27  ;;  %v790_v46 = vsel %vm510_vm5, %v789_v31, %v785_v7  ;;  %v815_v52 = vsel %vm814_vm13, %v727_v61, %v813_v59  ;;  %2113 = vmatpush3.msk.msra.mxu1 %vm898_vm11, %v893_v45  ;;  %v3319_v21 = vmov 0.0|0.0  }
 0x165   :  { %v794_v29 = vrot.slane %v2940_v57, %v2647_v10  ;;  %v341_v20 = vpop.xlane.xlu1 %340  ;;  %2148 = vmatprep.subr.bf16.mxu1 %v3319_v21  ;;  %vm894_vm12 = vcmask 31744   ;;  %v3320_v31 = vmov 0.0   ;;  %v981_v7 = vsub.s32 0, %v2565_v54 }
 0x166   :  { %v338_v33 = vpop.xlane.xlu0 %337  ;;  %v2964_v50 = vmul.f32 0.015625, %v341_v20  ;;  %v1086_v59 = vsub.s32 3, %v2565_v54  ;;  %v1191_v45 = vsub.s32 6, %v2565_v54 }
 0x167   :  { %v2962_v41 = vmul.f32 0.015625, %v338_v33  ;;  %v766_v33 = vsel %vm531_vm8, %v765_v53, %v761_v44  ;;  %v795_v20 = vsel %vm517_vm6, %v794_v29, %v790_v46  ;;  %v2328_v44 = vmov 0  }
 0x168   :  { %v804_v32 = vrot.slane %v2964_v50, %v2653_v27  ;;  %v817_v62 = vsel %vm816_vm14, %v766_v33, %v815_v52  ;;  %2172 = vset.pattern.permute.xlu0 %v2328_v44  ;;  %2173 = vset.pattern.permute.xlu1 %v2328_v44  ;;  %v1051_v33 = vsub.s32 2, %v2565_v54  ;;  %v1121_v52 = vsub.s32 4, %v2565_v54 }
 0x169   :  { %v799_v40 = vrot.slane %v2962_v41, %v2650_v26 }
 0x16b   :  { %v800_v1 = vsel %vm524_vm7, %v799_v40, %v795_v20  ;;  %v1016_v40 = vsub.s32 1, %v2565_v54 }
 0x16c   :  { %v805_v6 = vsel %vm531_vm8, %v804_v32, %v800_v1 }
 0x16d   :  { %v819_v47 = vsel %vm818_vm15, %v805_v6, %v817_v62  ;;  %v1156_v62 = vsub.s32 5, %v2565_v54 }
 0x16e   :  { %2110 = vmatmul.mubr.msk.f32.vlgmr.msra.gmra.mrb[0].mxu0 %vm149_vm0, %v819_v47 }
 0x241   :  { %v888_v29 = vpop.f32.mrb[0].mxu0 }
 0x242   :  { %v892_v11 = vmax.f32 %v888_v29, 0.0  ;;  %v2111_v49 = vpop.f32.mrb[1].mxu0 }
 0x244   :  { %2115 = vmatmul.mubr.msk.f32.vlgmr.msra.gmra.mrb[0].mxu1 %vm894_vm12, %v892_v11  ;;  %v1226_v11 = vsub.s32 7, %v2565_v54 }
 0x245   :  { %2133 = vmatprep.mubr.msk.f32.mxu1 %vm2326_vm1, %v3320_v31  ;;  %vm3355_vm1 = vcmask 1043459  }
 0x317   :  { %v968_v53 = vpop.f32.mrb[0].mxu1 }
 0x318   :  { %v2070_v48 = vmul.f32 -1.442695, %v968_v53  ;;  %v2116_v12 = vpop.f32.mrb[1].mxu1 }
 0x31a   :  { %2174 = vpow2.f32 %v2070_v48 }
 0x324   :  { %v2175_v42 = vpop.eup %2174 }
 0x325   :  { %v975_v23 = vadd.f32 1.0, %v2175_v42 }
 0x327   :  { %2176 = vrcp.f32 %v975_v23 }
 0x331   :  { %v2177_v61 = vpop.eup %2176 }
 0x332   :  { %v982_v46 = vrot.slane %v2177_v61, %v981_v7  ;;  %v1017_v32 = vrot.slane %v2177_v61, %v1016_v40  ;;  %v1052_v20 = vrot.slane %v2177_v61, %v1051_v33  ;;  %v1087_v1 = vrot.slane %v2177_v61, %v1086_v59 }
 0x333   :  { %v1122_v6 = vrot.slane %v2177_v61, %v1121_v52  ;;  %v1157_v47 = vrot.slane %v2177_v61, %v1156_v62  ;;  %v1192_v29 = vrot.slane %v2177_v61, %v1191_v45  ;;  %v1227_v49 = vrot.slane %v2177_v61, %v1226_v11  ;;  %v3323_v52 = vld [vmem:[#allocation23_spill] sm:$0xff]  ;;  %v3324_v45 = vld [vmem:[#allocation21_spill] sm:$0xff] }
 0x334   :  { %988 = vbcast.lane.b32.xlu1 %v982_v46, 264  ;;  %984 = vbcast.lane.b32.xlu0 %v982_v46, 256 }
 0x338   :  { %992 = vbcast.lane.b32.xlu1 %v982_v46, 272  ;;  %1000 = vbcast.lane.b32.xlu0 %v982_v46, 288 }
 0x33c   :  { %996 = vbcast.lane.b32.xlu1 %v982_v46, 280  ;;  %1008 = vbcast.lane.b32.xlu0 %v982_v46, 304 }
 0x340   :  { %1004 = vbcast.lane.b32.xlu1 %v982_v46, 296  ;;  %1019 = vbcast.lane.b32.xlu0 %v1017_v32, 256 }
 0x344   :  { %1012 = vbcast.lane.b32.xlu1 %v982_v46, 312  ;;  %1027 = vbcast.lane.b32.xlu0 %v1017_v32, 272 }
 0x348   :  { %1023 = vbcast.lane.b32.xlu1 %v1017_v32, 264  ;;  %1035 = vbcast.lane.b32.xlu0 %v1017_v32, 288 }
 0x34c   :  { %1031 = vbcast.lane.b32.xlu1 %v1017_v32, 280  ;;  %1043 = vbcast.lane.b32.xlu0 %v1017_v32, 304 }
 0x350   :  { %1039 = vbcast.lane.b32.xlu1 %v1017_v32, 296  ;;  %1058 = vbcast.lane.b32.xlu0 %v1052_v20, 264 }
 0x354   :  { %1054 = vbcast.lane.b32.xlu1 %v1052_v20, 256  ;;  %1089 = vbcast.lane.b32.xlu0 %v1087_v1, 256 }
 0x358   :  { %1062 = vbcast.lane.b32.xlu1 %v1052_v20, 272  ;;  %1066 = vbcast.lane.b32.xlu0 %v1052_v20, 280 }
 0x35c   :  { %1093 = vbcast.lane.b32.xlu1 %v1087_v1, 264  ;;  %1124 = vbcast.lane.b32.xlu0 %v1122_v6, 256 }
 0x360   :  { %1097 = vbcast.lane.b32.xlu1 %v1087_v1, 272  ;;  %1070 = vbcast.lane.b32.xlu0 %v1052_v20, 288 }
 0x364   :  { %1128 = vbcast.lane.b32.xlu1 %v1122_v6, 264  ;;  %1132 = vbcast.lane.b32.xlu0 %v1122_v6, 272 }
 0x368   :  { %1101 = vbcast.lane.b32.xlu1 %v1087_v1, 280  ;;  %1163 = vbcast.lane.b32.xlu0 %v1157_v47, 264 }
 0x36c   :  { %1159 = vbcast.lane.b32.xlu1 %v1157_v47, 256  ;;  %1105 = vbcast.lane.b32.xlu0 %v1087_v1, 288 }
 0x370   :  { %1074 = vbcast.lane.b32.xlu1 %v1052_v20, 296  ;;  %1167 = vbcast.lane.b32.xlu0 %v1157_v47, 272 }
 0x374   :  { %1136 = vbcast.lane.b32.xlu1 %v1122_v6, 280  ;;  %1198 = vbcast.lane.b32.xlu0 %v1192_v29, 264 }
 0x378   :  { %1194 = vbcast.lane.b32.xlu1 %v1192_v29, 256  ;;  %1078 = vbcast.lane.b32.xlu0 %v1052_v20, 304 }
 0x37c   :  { %1047 = vbcast.lane.b32.xlu1 %v1017_v32, 312  ;;  %1140 = vbcast.lane.b32.xlu0 %v1122_v6, 288  ;;  %v3321_v32 = vld [vmem:[#allocation18_spill] sm:$0xff] }
 0x380   :  { %1109 = vbcast.lane.b32.xlu1 %v1087_v1, 296  ;;  %1202 = vbcast.lane.b32.xlu0 %v1192_v29, 272 }
 0x384   :  { %1171 = vbcast.lane.b32.xlu1 %v1157_v47, 280  ;;  %1233 = vbcast.lane.b32.xlu0 %v1227_v49, 264 }
 0x388   :  { %1229 = vbcast.lane.b32.xlu1 %v1227_v49, 256  ;;  %1113 = vbcast.lane.b32.xlu0 %v1087_v1, 304 }
 0x38c   :  { %1082 = vbcast.lane.b32.xlu1 %v1052_v20, 312  ;;  %1175 = vbcast.lane.b32.xlu0 %v1157_v47, 288 }
 0x390   :  { %1144 = vbcast.lane.b32.xlu1 %v1122_v6, 296  ;;  %1237 = vbcast.lane.b32.xlu0 %v1227_v49, 272 }
 0x394   :  { %1206 = vbcast.lane.b32.xlu1 %v1192_v29, 280  ;;  %1148 = vbcast.lane.b32.xlu0 %v1122_v6, 304 }
 0x398   :  { %1117 = vbcast.lane.b32.xlu1 %v1087_v1, 312  ;;  %1210 = vbcast.lane.b32.xlu0 %v1192_v29, 288  ;;  %v3322_v1 = vld [vmem:[#allocation20_spill] sm:$0xff] }
 0x39c   :  { %1179 = vbcast.lane.b32.xlu1 %v1157_v47, 296  ;;  %1152 = vbcast.lane.b32.xlu0 %v1122_v6, 312 }
 0x3a0   :  { %1241 = vbcast.lane.b32.xlu1 %v1227_v49, 280  ;;  %1214 = vbcast.lane.b32.xlu0 %v1192_v29, 296 }
 0x3a4   :  { %1183 = vbcast.lane.b32.xlu1 %v1157_v47, 304  ;;  %1187 = vbcast.lane.b32.xlu0 %v1157_v47, 312 }
 0x3a6   :  { %v989_v54 = vpop.permute.xlu1 %988  ;;  %v985_v31 = vpop.permute.xlu0 %984 }
 0x3a7   :  { %v1323_v12 = vmul.f32 %v985_v31, %v2579_v0  ;;  %v1324_v61 = vmul.f32 %v989_v54, %v2586_v4 }
 0x3a8   :  { %1245 = vbcast.lane.b32.xlu1 %v1227_v49, 288  ;;  %1249 = vbcast.lane.b32.xlu0 %v1227_v49, 296 }
 0x3aa   :  { %v993_v53 = vpop.permute.xlu1 %992  ;;  %v1001_v48 = vpop.permute.xlu0 %1000 }
 0x3ab   :  { %v1325_v6 = vmul.f32 %v993_v53, %v3323_v52 }
 0x3ac   :  { %1218 = vbcast.lane.b32.xlu1 %v1192_v29, 304  ;;  %1253 = vbcast.lane.b32.xlu0 %v1227_v49, 304 }
 0x3ae   :  { %v997_v42 = vpop.permute.xlu1 %996  ;;  %v2996_v23 = vpop.permute.xlu0 %1008 }
 0x3b0   :  { %1222 = vbcast.lane.b32.xlu1 %v1192_v29, 312  ;;  %1467 = vperm.xlu0 %2172, %v1323_v12  }
 0x3b2   :  { %v1005_v7 = vpop.permute.xlu1 %1004  ;;  %v1020_v44 = vpop.permute.xlu0 %1019 }
 0x3b3   :  { %v1331_v33 = vmul.f32 %v1020_v44, %v3321_v32  ;;  %v3326_v44 = vld [vmem:[#allocation27_spill] sm:$0xff]  ;;  %v3327_v32 = vld [vmem:[#allocation26_spill] sm:$0xff] }
 0x3b4   :  { %1257 = vbcast.lane.b32.xlu1 %v1227_v49, 312  ;;  %v3325_v49 = vld [vmem:[#allocation24_spill] sm:$0xff] }
 0x3b6   :  { %v2999_v46 = vpop.permute.xlu1 %1012  ;;  %v1028_v40 = vpop.permute.xlu0 %1027 }
 0x3b7   :  { %v1333_v29 = vmul.f32 %v1028_v40, %v3324_v45  ;;  %v1327_v45 = vmul.f32 %v1001_v48, %v2632_v60 }
 0x3b8   :  { %1470 = vperm.xlu1 %2173, %v1324_v61  }
 0x3ba   :  { %v1024_v20 = vpop.permute.xlu1 %1023  ;;  %v1036_v59 = vpop.permute.xlu0 %1035 }
 0x3bb   :  { %v1332_v0 = vmul.f32 %v1024_v20, %v3322_v1  ;;  %v3328_v1 = vld [vmem:[#allocation28_spill] sm:$0xff] }
 0x3bc   :  { %1491 = vperm.xlu1 %2173, %v1331_v33  }
 0x3bd   :  { %1494 = vperm.xlu0 %2172, %v1332_v0   ;;  %v1326_v0 = vmul.f32 %v997_v42, %v3328_v1 }
 0x3be   :  { %v1032_v62 = vpop.permute.xlu1 %1031  ;;  %v3004_v47 = vpop.permute.xlu0 %1043 }
 0x3bf   :  { %v1334_v61 = vmul.f32 %v1032_v62, %v3326_v44  ;;  %v3330_v44 = vld [vmem:[#allocation33_spill] sm:$0xff] }
 0x3c0   :  { %1473 = vperm.xlu1 %2173, %v1325_v6  }
 0x3c1   :  { %1497 = vperm.xlu0 %2172, %v1333_v29   ;;  %v3329_v29 = vld [vmem:[#allocation29_spill] sm:$0xff] }
 0x3c2   :  { %v1040_v4 = vpop.permute.xlu1 %1039  ;;  %v1059_v11 = vpop.permute.xlu0 %1058 }
 0x3c3   :  { %v1340_v54 = vmul.f32 %v1059_v11, %v3325_v49 }
 0x3c5   :  { %1518 = vperm.xlu0 %2172, %v1340_v54  }
 0x3c6   :  { %v1055_v31 = vpop.permute.xlu1 %1054  ;;  %v1090_v12 = vpop.permute.xlu0 %1089 }
 0x3c7   :  { %v1339_v33 = vmul.f32 %v1055_v31, %v3327_v32  ;;  %v1347_v40 = vmul.f32 %v1090_v12, %v2644_v9  ;;  %v1335_v12 = vmul.f32 %v1036_v59, %v2678_v63  ;;  %v3331_v32 = vld [vmem:[#allocation31_spill] sm:$0xff] }
 0x3c9   :  { %1515 = vperm.xlu1 %2173, %v1339_v33   ;;  %1500 = vperm.xlu0 %2172, %v1334_v61   ;;  %v1328_v33 = vmul.f32 %v1005_v7, %v3331_v32 }
 0x3ca   :  { %v1063_v53 = vpop.permute.xlu1 %1062  ;;  %v1067_v20 = vpop.permute.xlu0 %1066 }
 0x3cb   :  { %v1341_v11 = vmul.f32 %v1063_v53, %v3329_v29  ;;  %v1342_v54 = vmul.f32 %v1067_v20, %v2660_v24  ;;  %v3332_v53 = vld [vmem:[#allocation30_spill] sm:$0xff]  ;;  %v3336_v29 = vld [vmem:[#allocation36_spill] sm:$0xff] }
 0x3cc   :  { %v3333_v20 = vld [vmem:[#allocation34_spill] sm:$0xff] }
 0x3cd   :  { %1476 = vperm.xlu1 %2173, %v1326_v0   ;;  %1539 = vperm.xlu0 %2172, %v1347_v40   ;;  %v3334_v40 = vld [vmem:[#allocation32_spill] sm:$0xff] }
 0x3ce   :  { %v1094_v52 = vpop.permute.xlu1 %1093  ;;  %v1125_v6 = vpop.permute.xlu0 %1124 }
 0x3cf   :  { %v1348_v31 = vmul.f32 %v1094_v52, %v2635_v15  ;;  %v1355_v61 = vmul.f32 %v1125_v6, %v3330_v44  ;;  %v3335_v6 = vld [vmem:[#allocation35_spill] sm:$0xff] }
 0x3d1   :  { %1521 = vperm.xlu1 %2173, %v1341_v11   ;;  %1479 = vperm.xlu0 %2172, %v1327_v45   ;;  %v1336_v45 = vmul.f32 %v1040_v4, %v3335_v6 }
 0x3d2   :  { %v1098_v62 = vpop.permute.xlu1 %1097  ;;  %v1071_v49 = vpop.permute.xlu0 %1070 }
 0x3d3   :  { %v1349_v1 = vmul.f32 %v1098_v62, %v3332_v53  ;;  %v1343_v0 = vmul.f32 %v1071_v49, %v3333_v20 }
 0x3d5   :  { %1542 = vperm.xlu1 %2173, %v1348_v31   ;;  %1524 = vperm.xlu0 %2172, %v1342_v54   ;;  %v3337_v54 = vld [vmem:[#allocation37_spill] sm:$0xff] }
 0x3d6   :  { %v1129_v42 = vpop.permute.xlu1 %1128  ;;  %v1133_v9 = vpop.permute.xlu0 %1132 }
 0x3d7   :  { %v1356_v52 = vmul.f32 %v1129_v42, %v3334_v40  ;;  %v1357_v11 = vmul.f32 %v1133_v9, %v3336_v29  ;;  %v3342_v29 = vld [vmem:[#allocation43_spill] sm:$0xff] }
 0x3d9   :  { %1503 = vperm.xlu1 %2173, %v1335_v12   ;;  %1563 = vperm.xlu0 %2172, %v1355_v61   ;;  %v3338_v12 = vld [vmem:[#allocation38_spill] sm:$0xff]  ;;  %v3339_v61 = vld [vmem:[#allocation40_spill] sm:$0xff] }
 0x3da   :  { %v1102_v60 = vpop.permute.xlu1 %1101  ;;  %v1164_v48 = vpop.permute.xlu0 %1163  ;;  %v1337_v32 = vmul.f32 %v3004_v47, %v3339_v61 }
 0x3db   :  { %v1350_v31 = vmul.f32 %v1102_v60, %v3337_v54  ;;  %v1364_v44 = vmul.f32 %v1164_v48, %v3338_v12 }
 0x3dd   :  { %1545 = vperm.xlu1 %2173, %v1349_v1   ;;  %1482 = vperm.xlu0 %2172, %v1328_v33   ;;  %v3340_v33 = vld [vmem:[#allocation39_spill] sm:$0xff]  ;;  %v1329_v1 = vmul.f32 %v2996_v23, %v2736_v17 }
 0x3de   :  { %v1160_v24 = vpop.permute.xlu1 %1159  ;;  %v1106_v15 = vpop.permute.xlu0 %1105 }
 0x3df   :  { %v1363_v53 = vmul.f32 %v1160_v24, %v3340_v33  ;;  %v1351_v60 = vmul.f32 %v1106_v15, %v2747_v3 }
 0x3e1   :  { %1566 = vperm.xlu1 %2173, %v1356_v52   ;;  %1527 = vperm.xlu0 %2172, %v1343_v0  }
 0x3e2   :  { %v1075_v63 = vpop.permute.xlu1 %1074  ;;  %v1168_v59 = vpop.permute.xlu0 %1167 }
 0x3e3   :  { %v1344_v0 = vmul.f32 %v1075_v63, %v2750_v5  ;;  %v1365_v40 = vmul.f32 %v1168_v59, %v2787_v37  ;;  %v1330_v37 = vmul.f32 %v2999_v46, %v2771_v19 }
 0x3e5   :  { %1506 = vperm.xlu1 %2173, %v1336_v45   ;;  %1569 = vperm.xlu0 %2172, %v1357_v11  }
 0x3e6   :  { %v1137_v7 = vpop.permute.xlu1 %1136  ;;  %v1199_v62 = vpop.permute.xlu0 %1198 }
 0x3e7   :  { %v1358_v52 = vmul.f32 %v1137_v7, %v2790_v14  ;;  %v1372_v6 = vmul.f32 %v1199_v62, %v2793_v13  ;;  %v3341_v13 = vld [vmem:[#allocation41_spill] sm:$0xff] }
 0x3e9   :  { %1548 = vperm.xlu1 %2173, %v1350_v31   ;;  %1590 = vperm.xlu0 %2172, %v1364_v44   ;;  %v3345_v31 = vld [vmem:[#allocation42_spill] sm:$0xff] }
 0x3ea   :  { %v1195_v49 = vpop.permute.xlu1 %1194  ;;  %v1079_v42 = vpop.permute.xlu0 %1078 }
 0x3eb   :  { %v1371_v3 = vmul.f32 %v1195_v49, %v2796_v22  ;;  %v1345_v45 = vmul.f32 %v1079_v42, %v3341_v13  ;;  %v3343_v22 = vld [vmem:[#allocation44_spill] sm:$0xff]  ;;  %v3346_v42 = vld [vmem:[#allocation46_spill] sm:$0xff] }
 0x3ed   :  { %1587 = vperm.xlu1 %2173, %v1363_v53   ;;  %1509 = vperm.xlu0 %2172, %v1337_v32  }
 0x3ee   :  { %v1048_v4 = vpop.permute.xlu1 %1047  ;;  %v1141_v9 = vpop.permute.xlu0 %1140 }
 0x3ef   :  { %v1338_v23 = vmul.f32 %v1048_v4, %v2768_v34  ;;  %v1359_v7 = vmul.f32 %v1141_v9, %v3343_v22 }
 0x3f1   :  { %1485 = vperm.xlu1 %2173, %v1329_v1   ;;  %1551 = vperm.xlu0 %2172, %v1351_v60  }
 0x3f2   :  { %v1110_v48 = vpop.permute.xlu1 %1109  ;;  %v1203_v20 = vpop.permute.xlu0 %1202 }
 0x3f3   :  { %v1352_v63 = vmul.f32 %v1110_v48, %v2814_v25  ;;  %v3344_v25 = vld [vmem:[#allocation45_spill] sm:$0xff] }
 0x3f4   :  { %v1373_v46 = vmul.f32 %v1203_v20, %v3344_v25 }
 0x3f5   :  { %1530 = vperm.xlu1 %2173, %v1344_v0   ;;  %1593 = vperm.xlu0 %2172, %v1365_v40  }
 0x3f6   :  { %v1172_v47 = vpop.permute.xlu1 %1171  ;;  %v1234_v24 = vpop.permute.xlu0 %1233 }
 0x3f7   :  { %v1366_v11 = vmul.f32 %v1172_v47, %v3342_v29  ;;  %v1380_v61 = vmul.f32 %v1234_v24, %v3346_v42 }
 0x3f9   :  { %1572 = vperm.xlu1 %2173, %v1358_v52   ;;  %1614 = vperm.xlu0 %2172, %v1372_v6   ;;  %v3347_v52 = vld [vmem:[#allocation47_spill] sm:$0xff] }
 0x3fa   :  { %v1230_v17 = vpop.permute.xlu1 %1229  ;;  %v1114_v15 = vpop.permute.xlu0 %1113 }
 0x3fb   :  { %v1379_v62 = vmul.f32 %v1230_v17, %v2841_v43  ;;  %v1353_v43 = vmul.f32 %v1114_v15, %v2853_v36  ;;  %v3348_v17 = vld [vmem:[#allocation48_spill] sm:$0xff]  ;;  %v3349_v15 = vld [vmem:[#allocation49_spill] sm:$0xff] }
 0x3fd   :  { %1611 = vperm.xlu1 %2173, %v1371_v3   ;;  %1512 = vperm.xlu0 %2172, %v1338_v23  }
 0x3fe   :  { %v1083_v5 = vpop.permute.xlu1 %1082  ;;  %v1176_v59 = vpop.permute.xlu0 %1175 }
 0x3ff   :  { %v1346_v12 = vmul.f32 %v1083_v5, %v3345_v31  ;;  %v1367_v9 = vmul.f32 %v1176_v59, %v2873_v55  ;;  %v1390_v59 = vld [vmem:[#allocation8 + $0x18] sm:$0xff] }
 0x401   :  { %1488 = vperm.xlu1 %2173, %v1330_v37   ;;  %1554 = vperm.xlu0 %2172, %v1352_v63   ;;  %v1389_v63 = vld [vmem:[#allocation8 + $0x10] sm:$0xff] }
 0x402   :  { %v1145_v14 = vpop.permute.xlu1 %1144  ;;  %v1238_v54 = vpop.permute.xlu0 %1237 }
 0x403   :  { %v1360_v32 = vmul.f32 %v1145_v14, %v2850_v38  ;;  %v1381_v38 = vmul.f32 %v1238_v54, %v2891_v8  ;;  %v2152_v14 = vpack.c.bf16 %v1390_v59, %v1389_v63 }
 0x405   :  { %1596 = vperm.xlu0 %2172, %v1366_v11   ;;  %1533 = vperm.xlu1 %2173, %v1345_v45   ;;  %v1391_v11 = vld [vmem:[#allocation8 + $0x20] sm:$0xff] }
 0x406   :  { %v1207_v34 = vpop.permute.xlu1 %1206  ;;  %v1149_v44 = vpop.permute.xlu0 %1148 }
 0x407   :  { %v1374_v53 = vmul.f32 %v1207_v34, %v2866_v16  ;;  %v1361_v16 = vmul.f32 %v1149_v44, %v2899_v30 }
 0x409   :  { %1635 = vperm.xlu0 %2172, %v1379_v62   ;;  %1575 = vperm.xlu1 %2173, %v1359_v7   ;;  %v3350_v62 = vld [vmem:[#allocation16_spill] sm:$0xff] }
 0x40a   :  { %v1118_v19 = vpop.permute.xlu1 %1117  ;;  %v1211_v4 = vpop.permute.xlu0 %1210 }
 0x40b   :  { %v1354_v1 = vmul.f32 %v1118_v19, %v2885_v51  ;;  %v1375_v55 = vmul.f32 %v1211_v4, %v2901_v18  ;;  %v1387_v18 = vld [vmem:[#allocation8] sm:$0xff]  ;;  %v3351_v19 = vld [vmem:[#allocation17_spill] sm:$0xff] }
 0x40d   :  { %1536 = vperm.xlu0 %2172, %v1346_v12   ;;  %1617 = vperm.xlu1 %2173, %v1373_v46  }
 0x40e   :  { %v1180_v49 = vpop.permute.xlu1 %1179  ;;  %v1153_v48 = vpop.permute.xlu0 %1152 }
 0x40f   :  { %v1368_v20 = vmul.f32 %v1180_v49, %v2894_v56  ;;  %v1362_v8 = vmul.f32 %v1153_v48, %v2907_v39 }
 0x411   :  { %1578 = vperm.xlu0 %2172, %v1360_v32   ;;  %1638 = vperm.xlu1 %2173, %v1380_v61   ;;  %v3352_v32 = vld [vmem:[#allocation19_spill] sm:$0xff] }
 0x412   :  { %v1242_v33 = vpop.permute.xlu1 %1241  ;;  %v1215_v40 = vpop.permute.xlu0 %1214 }
 0x413   :  { %v1382_v0 = vmul.f32 %v1242_v33, %v2914_v28  ;;  %v1376_v28 = vmul.f32 %v1215_v40, %v3347_v52 }
 0x415   :  { %1620 = vperm.xlu0 %2172, %v1374_v53   ;;  %1557 = vperm.xlu1 %2173, %v1353_v43  }
 0x416   :  { %v1184_v60 = vpop.permute.xlu1 %1183  ;;  %v1188_v24 = vpop.permute.xlu0 %1187 }
 0x417   :  { %v1369_v51 = vmul.f32 %v1184_v60, %v2903_v35  ;;  %v1388_v35 = vld [vmem:[#allocation8 + $0x8] sm:$0xff]  ;;  %v1370_v5 = vmul.f32 %v1188_v24, %v3349_v15 }
 0x418   :  { %v2149_v23 = vpack.c.bf16 %v1388_v35, %v1387_v18 }
 0x419   :  { %1560 = vperm.xlu0 %2172, %v1354_v1   ;;  %1599 = vperm.xlu1 %2173, %v1367_v9  }
 0x41a   :  { %v1246_v36 = vpop.permute.xlu1 %1245  ;;  %v1250_v6 = vpop.permute.xlu0 %1249  ;;  %2150 = vmatpush3.bf16.msra.mxu1 %v2149_v23 }
 0x41b   :  { %v1383_v56 = vmul.f32 %v1246_v36, %v2925_v2  ;;  %2151 = vmatprep.subr.bf16.mxu1 %v3319_v21  ;;  %v1384_v13 = vmul.f32 %v1250_v6, %v2940_v57  ;;  %v1393_v57 = vld [vmem:[#allocation8 + $0x30] sm:$0xff] }
 0x41d   :  { %1602 = vperm.xlu0 %2172, %v1368_v20   ;;  %1641 = vperm.xlu1 %2173, %v1381_v38   ;;  %v3353_v20 = vld [vmem:[#allocation22_spill] sm:$0xff] }
 0x41e   :  { %v1219_v47 = vpop.permute.xlu1 %1218  ;;  %v1254_v2 = vpop.permute.xlu0 %1253  ;;  %2153 = vmatpush3.bf16.msra.mxu1 %v2152_v14 }
 0x41f   :  { %v1377_v3 = vmul.f32 %v1219_v47, %v3348_v17  ;;  %2154 = vmatprep.subr.bf16.mxu1 %v3319_v21  ;;  %v1385_v22 = vmul.f32 %v1254_v2, %v2962_v41 }
 0x421   :  { %1644 = vperm.xlu0 %2172, %v1382_v0   ;;  %1581 = vperm.xlu1 %2173, %v1361_v16  }
 0x422   :  { %v1223_v30 = vpop.permute.xlu1 %1222 }
 0x423   :  { %v1378_v37 = vmul.f32 %v1223_v30, %v2938_v58  ;;  %v1392_v58 = vld [vmem:[#allocation8 + $0x28] sm:$0xff]  ;;  %v3354_v30 = vld [vmem:[#allocation25_spill] sm:$0xff] }
 0x424   :  { %v2155_v34 = vpack.c.bf16 %v1392_v58, %v1391_v11 }
 0x425   :  { %1605 = vperm.xlu0 %2172, %v1369_v51   ;;  %1623 = vperm.xlu1 %2173, %v1375_v55  }
 0x426   :  { %v1258_v39 = vpop.permute.xlu1 %1257  ;;  %2156 = vmatpush3.bf16.msra.mxu1 %v2155_v34 }
 0x427   :  { %v1386_v45 = vmul.f32 %v1258_v39, %v2964_v50  ;;  %2157 = vmatprep.subr.bf16.mxu1 %v3319_v21  ;;  %v1394_v50 = vld [vmem:[#allocation8 + $0x38] sm:$0xff] }
 0x428   :  { %v2158_v31 = vpack.c.bf16 %v1394_v50, %v1393_v57 }
 0x429   :  { %1647 = vperm.xlu0 %2172, %v1383_v56   ;;  %1584 = vperm.xlu1 %2173, %v1362_v8  }
 0x42a   :  { %2159 = vmatpush3.bf16.msra.mxu1 %v2158_v31 }
 0x42d   :  { %1629 = vperm.xlu0 %2172, %v1377_v3   ;;  %1626 = vperm.xlu1 %2173, %v1376_v28  }
 0x42f   :  { %v1468_v29 = vpop.permute.xlu0 %1467 }
 0x430   :  { %v1661_v54 = vrot.slane %v1468_v29, %v3350_v62 }
 0x431   :  { %1632 = vperm.xlu0 %2172, %v1378_v37   ;;  %1608 = vperm.xlu1 %2173, %v1370_v5  }
 0x435   :  { %1656 = vperm.xlu0 %2172, %v1386_v45   ;;  %1650 = vperm.xlu1 %2173, %v1384_v13  }
 0x437   :  { %v1471_v7 = vpop.permute.xlu1 %1470 }
 0x438   :  { %v1665_v25 = vrot.slane %v1471_v7, %v3351_v19 }
 0x439   :  { %1653 = vperm.xlu1 %2173, %v1385_v22  }
 0x43a   :  { %v1666_v46 = vsel %vm489_vm2, %v1665_v25, %v1661_v54 }
 0x43b   :  { %v1492_v12 = vpop.permute.xlu1 %1491 }
 0x43c   :  { %v1700_v44 = vrot.slane %v1492_v12, %v3350_v62  ;;  %v1495_v49 = vpop.permute.xlu0 %1494 }
 0x43d   :  { %v1704_v41 = vrot.slane %v1495_v49, %v3351_v19 }
 0x43f   :  { %v1705_v42 = vsel %vm489_vm2, %v1704_v41, %v1700_v44  ;;  %v1474_v61 = vpop.permute.xlu1 %1473 }
 0x440   :  { %v1670_v33 = vrot.slane %v1474_v61, %v3352_v32  ;;  %v1498_v43 = vpop.permute.xlu0 %1497 }
 0x441   :  { %v1709_v21 = vrot.slane %v1498_v43, %v3352_v32 }
 0x442   :  { %v1671_v53 = vsel %vm496_vm3, %v1670_v33, %v1666_v46 }
 0x443   :  { %v1710_v4 = vsel %vm496_vm3, %v1709_v21, %v1705_v42 }
 0x444   :  { %v1519_v9 = vpop.permute.xlu0 %1518 }
 0x445   :  { %v1743_v48 = vrot.slane %v1519_v9, %v3351_v19 }
 0x448   :  { %v1516_v1 = vpop.permute.xlu1 %1515  ;;  %v1501_v60 = vpop.permute.xlu0 %1500 }
 0x449   :  { %v1739_v38 = vrot.slane %v1516_v1, %v3350_v62  ;;  %v1714_v36 = vrot.slane %v1501_v60, %v3353_v20 }
 0x44b   :  { %v1744_v16 = vsel %vm489_vm2, %v1743_v48, %v1739_v38  ;;  %v1715_v0 = vsel %vm503_vm4, %v1714_v36, %v1710_v4 }
 0x44c   :  { %v1477_v40 = vpop.permute.xlu1 %1476  ;;  %v1540_v55 = vpop.permute.xlu0 %1539 }
 0x44d   :  { %v1675_v51 = vrot.slane %v1477_v40, %v3353_v20  ;;  %v1778_v18 = vrot.slane %v1540_v55, %v3350_v62 }
 0x44f   :  { %v1676_v47 = vsel %vm503_vm4, %v1675_v51, %v1671_v53 }
 0x450   :  { %v1522_v24 = vpop.permute.xlu1 %1521  ;;  %v1480_v8 = vpop.permute.xlu0 %1479 }
 0x451   :  { %v1748_v56 = vrot.slane %v1522_v24, %v3352_v32  ;;  %v1680_v52 = vrot.slane %v1480_v8, %v3354_v30 }
 0x453   :  { %v1749_v28 = vsel %vm496_vm3, %v1748_v56, %v1744_v16  ;;  %v1681_v6 = vsel %vm510_vm5, %v1680_v52, %v1676_v47 }
 0x454   :  { %v1543_v17 = vpop.permute.xlu1 %1542  ;;  %v1525_v3 = vpop.permute.xlu0 %1524 }
 0x455   :  { %v1782_v35 = vrot.slane %v1543_v17, %v3351_v19  ;;  %v1753_v23 = vrot.slane %v1525_v3, %v3353_v20 }
 0x457   :  { %v1783_v15 = vsel %vm489_vm2, %v1782_v35, %v1778_v18  ;;  %v1754_v5 = vsel %vm503_vm4, %v1753_v23, %v1749_v28 }
 0x458   :  { %v1504_v37 = vpop.permute.xlu1 %1503  ;;  %v1564_v39 = vpop.permute.xlu0 %1563 }
 0x459   :  { %v1719_v2 = vrot.slane %v1504_v37, %v3354_v30  ;;  %v1817_v22 = vrot.slane %v1564_v39, %v3350_v62 }
 0x45b   :  { %v1720_v63 = vsel %vm510_vm5, %v1719_v2, %v1715_v0 }
 0x45c   :  { %v1546_v59 = vpop.permute.xlu1 %1545  ;;  %v1483_v14 = vpop.permute.xlu0 %1482 }
 0x45d   :  { %v1787_v13 = vrot.slane %v1546_v59, %v3352_v32  ;;  %v1685_v45 = vrot.slane %v1483_v14, %v2647_v10 }
 0x45f   :  { %v1788_v29 = vsel %vm496_vm3, %v1787_v13, %v1783_v15  ;;  %v1686_v11 = vsel %vm517_vm6, %v1685_v45, %v1681_v6 }
 0x460   :  { %v1567_v58 = vpop.permute.xlu1 %1566  ;;  %v1528_v34 = vpop.permute.xlu0 %1527 }
 0x461   :  { %v1821_v7 = vrot.slane %v1567_v58, %v3351_v19  ;;  %v1758_v54 = vrot.slane %v1528_v34, %v3354_v30 }
 0x463   :  { %v1822_v25 = vsel %vm489_vm2, %v1821_v7, %v1817_v22  ;;  %v1759_v57 = vsel %vm510_vm5, %v1758_v54, %v1754_v5 }
 0x464   :  { %v1507_v50 = vpop.permute.xlu1 %1506  ;;  %v1570_v46 = vpop.permute.xlu0 %1569 }
 0x465   :  { %v1724_v31 = vrot.slane %v1507_v50, %v2647_v10  ;;  %v1826_v12 = vrot.slane %v1570_v46, %v3352_v32 }
 0x467   :  { %v1725_v44 = vsel %vm517_vm6, %v1724_v31, %v1720_v63  ;;  %v3112_v49 = vsel %vm496_vm3, %v1826_v12, %v1822_v25 }
 0x468   :  { %v1549_v41 = vpop.permute.xlu1 %1548  ;;  %v1591_v42 = vpop.permute.xlu0 %1590 }
 0x469   :  { %v1792_v61 = vrot.slane %v1549_v41, %v3353_v20  ;;  %v1860_v53 = vrot.slane %v1591_v42, %v3351_v19 }
 0x46b   :  { %v1793_v33 = vsel %vm503_vm4, %v1792_v61, %v1788_v29 }
 0x46c   :  { %v1588_v43 = vpop.permute.xlu1 %1587  ;;  %v1510_v21 = vpop.permute.xlu0 %1509 }
 0x46d   :  { %v1856_v4 = vrot.slane %v1588_v43, %v3350_v62  ;;  %v1729_v9 = vrot.slane %v1510_v21, %v2650_v26 }
 0x46f   :  { %v3120_v1 = vsel %vm489_vm2, %v1860_v53, %v1856_v4  ;;  %v1730_v60 = vsel %vm524_vm7, %v1729_v9, %v1725_v44 }
 0x470   :  { %v1486_v48 = vpop.permute.xlu1 %1485  ;;  %v1552_v38 = vpop.permute.xlu0 %1551 }
 0x471   :  { %v1690_v36 = vrot.slane %v1486_v48, %v2650_v26  ;;  %v1797_v58 = vrot.slane %v1552_v38, %v3354_v30 }
 0x473   :  { %v1691_v16 = vsel %vm524_vm7, %v1690_v36, %v1686_v11  ;;  %v1798_v25 = vsel %vm510_vm5, %v1797_v58, %v1793_v33 }
 0x474   :  { %v1531_v0 = vpop.permute.xlu1 %1530  ;;  %v3125_v40 = vpop.permute.xlu0 %1593 }
 0x475   :  { %v1763_v5 = vrot.slane %v1531_v0, %v2647_v10 }
 0x477   :  { %v1764_v63 = vsel %vm517_vm6, %v1763_v5, %v1759_v57 }
 0x478   :  { %v1573_v55 = vpop.permute.xlu1 %1572  ;;  %v3127_v51 = vpop.permute.xlu0 %1614 }
 0x479   :  { %v1831_v53 = vrot.slane %v1573_v55, %v3353_v20  ;;  %v1865_v55 = vrot.slane %v3125_v40, %v3352_v32 }
 0x47b   :  { %v1832_v38 = vsel %vm503_vm4, %v1831_v53, %v3112_v49  ;;  %v1866_v40 = vsel %vm496_vm3, %v1865_v55, %v3120_v1 }
 0x47c   :  { %v3129_v47 = vpop.permute.xlu1 %1611  ;;  %v1513_v24 = vpop.permute.xlu0 %1512 }
 0x47d   :  { %v1734_v8 = vrot.slane %v1513_v24, %v2653_v27 }
 0x47f   :  { %v1735_v6 = vsel %vm531_vm8, %v1734_v8, %v1730_v60 }
 0x480   :  { %v1489_v56 = vpop.permute.xlu1 %1488  ;;  %v1555_v52 = vpop.permute.xlu0 %1554 }
 0x481   :  { %v1695_v28 = vrot.slane %v1489_v56, %v2653_v27  ;;  %v1802_v7 = vrot.slane %v1555_v52, %v2647_v10 }
 0x483   :  { %v1696_v17 = vsel %vm531_vm8, %v1695_v28, %v1691_v16  ;;  %v1803_v46 = vsel %vm517_vm6, %v1802_v7, %v1798_v25 }
 0x484   :  { %v1970_v3 = vsel %vm806_vm9, %v1735_v6, %v1696_v17  ;;  %v1534_v18 = vpop.permute.xlu1 %1533  ;;  %v1597_v35 = vpop.permute.xlu0 %1596  ;;  %vm3356_vm9 = vcmask 1044484  }
 0x485   :  { %v1768_v37 = vrot.slane %v1534_v18, %v2650_v26  ;;  %v1870_v52 = vrot.slane %v1597_v35, %v3353_v20  ;;  %v1895_v18 = vrot.slane %v3129_v47, %v3350_v62 }
 0x487   :  { %v1769_v14 = vsel %vm524_vm7, %v1768_v37, %v1764_v63  ;;  %v1899_v37 = vrot.slane %v3127_v51, %v3351_v19 }
 0x488   :  { %v1576_v23 = vpop.permute.xlu1 %1575  ;;  %v3136_v15 = vpop.permute.xlu0 %1635 }
 0x489   :  { %v1836_v33 = vrot.slane %v1576_v23, %v3354_v30 }
 0x48b   :  { %v1837_v36 = vsel %vm510_vm5, %v1836_v33, %v1832_v38 }
 0x48c   :  { %v3140_v39 = vpop.permute.xlu1 %1617  ;;  %v1537_v2 = vpop.permute.xlu0 %1536 }
 0x48d   :  { %v1773_v59 = vrot.slane %v1537_v2, %v2653_v27  ;;  %v1904_v5 = vrot.slane %v3140_v39, %v3352_v32  ;;  %v1871_v2 = vsel %vm503_vm4, %v1870_v52, %v1866_v40 }
 0x48f   :  { %v1774_v13 = vsel %vm531_vm8, %v1773_v59, %v1769_v14 }
 0x490   :  { %v1971_v45 = vsel %vm808_vm10, %v1774_v13, %v1970_v3  ;;  %v3147_v29 = vpop.permute.xlu1 %1638  ;;  %v1579_v11 = vpop.permute.xlu0 %1578  ;;  %v1900_v13 = vsel %vm489_vm2, %v1899_v37, %v1895_v18 }
 0x491   :  { %v1841_v60 = vrot.slane %v1579_v11, %v2647_v10  ;;  %v1905_v51 = vsel %vm496_vm3, %v1904_v5, %v1900_v13  ;;  %v1938_v58 = vrot.slane %v3147_v29, %v3351_v19 }
 0x493   :  { %v1842_v24 = vsel %vm517_vm6, %v1841_v60, %v1837_v36 }
 0x494   :  { %v1558_v34 = vpop.permute.xlu1 %1557  ;;  %v1621_v22 = vpop.permute.xlu0 %1620 }
 0x495   :  { %v1807_v54 = vrot.slane %v1558_v34, %v2650_v26  ;;  %v1909_v63 = vrot.slane %v1621_v22, %v3353_v20  ;;  %v1934_v22 = vrot.slane %v3136_v15, %v3350_v62 }
 0x497   :  { %v1808_v12 = vsel %vm524_vm7, %v1807_v54, %v1803_v46  ;;  %v1910_v7 = vsel %vm503_vm4, %v1909_v63, %v1905_v51  ;;  %v1939_v15 = vsel %vm489_vm2, %v1938_v58, %v1934_v22 }
 0x498   :  { %v1600_v57 = vpop.permute.xlu1 %1599  ;;  %v1561_v50 = vpop.permute.xlu0 %1560 }
 0x499   :  { %v1812_v31 = vrot.slane %v1561_v50, %v2653_v27  ;;  %v1875_v6 = vrot.slane %v1600_v57, %v3354_v30 }
 0x49b   :  { %v1813_v44 = vsel %vm531_vm8, %v1812_v31, %v1808_v12  ;;  %v1876_v59 = vsel %vm510_vm5, %v1875_v6, %v1871_v2 }
 0x49c   :  { %v1972_v41 = vsel %vm3355_vm1, %v1813_v44, %v1971_v45  ;;  %v1642_v42 = vpop.permute.xlu1 %1641  ;;  %v1603_v61 = vpop.permute.xlu0 %1602 }
 0x49d   :  { %v1880_v23 = vrot.slane %v1603_v61, %v2647_v10  ;;  %v1943_v54 = vrot.slane %v1642_v42, %v3352_v32 }
 0x49f   :  { %v1881_v1 = vsel %vm517_vm6, %v1880_v23, %v1876_v59  ;;  %v1944_v44 = vsel %vm496_vm3, %v1943_v54, %v1939_v15 }
 0x4a0   :  { %v1582_v43 = vpop.permute.xlu1 %1581  ;;  %v1645_v21 = vpop.permute.xlu0 %1644 }
 0x4a1   :  { %v1846_v48 = vrot.slane %v1582_v43, %v2650_v26  ;;  %v1948_v57 = vrot.slane %v1645_v21, %v3353_v20 }
 0x4a3   :  { %v1847_v56 = vsel %vm524_vm7, %v1846_v48, %v1842_v24  ;;  %v2071_v48 = vld [vmem:[#allocation10] ss:$0 sm:$0xff] }
 0x4a4   :  { %v1624_v4 = vpop.permute.xlu1 %1623  ;;  %v1606_v9 = vpop.permute.xlu0 %1605 }
 0x4a5   :  { %v1885_v35 = vrot.slane %v1606_v9, %v2650_v26  ;;  %v1914_v47 = vrot.slane %v1624_v4, %v3354_v30 }
 0x4a7   :  { %v1886_v34 = vsel %vm524_vm7, %v1885_v35, %v1881_v1  ;;  %v1915_v50 = vsel %vm510_vm5, %v1914_v47, %v1910_v7 }
 0x4a8   :  { %v1585_v16 = vpop.permute.xlu1 %1584  ;;  %v1648_v0 = vpop.permute.xlu0 %1647 }
 0x4a9   :  { %v1851_v8 = vrot.slane %v1585_v16, %v2653_v27  ;;  %v1953_v29 = vrot.slane %v1648_v0, %v3354_v30 }
 0x4ab   :  { %v1852_v28 = vsel %vm531_vm8, %v1851_v8, %v1847_v56 }
 0x4ac   :  { %v1973_v49 = vsel %vm3356_vm9, %v1852_v28, %v1972_v41  ;;  %v1627_v17 = vpop.permute.xlu1 %1626  ;;  %v1630_v3 = vpop.permute.xlu0 %1629  ;;  %v1949_v41 = vsel %vm503_vm4, %v1948_v57, %v1944_v44 }
 0x4ad   :  { %v1919_v39 = vrot.slane %v1627_v17, %v2647_v10  ;;  %v1924_v46 = vrot.slane %v1630_v3, %v2650_v26  ;;  %v1954_v43 = vsel %vm510_vm5, %v1953_v29, %v1949_v41 }
 0x4af   :  { %v1920_v12 = vsel %vm517_vm6, %v1919_v39, %v1915_v50 }
 0x4b0   :  { %v1609_v14 = vpop.permute.xlu1 %1608  ;;  %v1633_v11 = vpop.permute.xlu0 %1632  ;;  %v1925_v42 = vsel %vm524_vm7, %v1924_v46, %v1920_v12 }
 0x4b1   :  { %v1890_v45 = vrot.slane %v1609_v14, %v2653_v27  ;;  %v1929_v62 = vrot.slane %v1633_v11, %v2653_v27 }
 0x4b3   :  { %v1891_v25 = vsel %vm531_vm8, %v1890_v45, %v1886_v34  ;;  %v1930_v30 = vsel %vm531_vm8, %v1929_v62, %v1925_v42 }
 0x4b4   :  { %v1974_v31 = vsel %vm814_vm13, %v1891_v25, %v1973_v49  ;;  %v1651_v19 = vpop.permute.xlu1 %1650  ;;  %v1657_v20 = vpop.permute.xlu0 %1656 }
 0x4b5   :  { %v1958_v32 = vrot.slane %v1651_v19, %v2647_v10  ;;  %v1968_v33 = vrot.slane %v1657_v20, %v2653_v27  ;;  %v1975_v4 = vsel %vm816_vm14, %v1930_v30, %v1974_v31 }
 0x4b7   :  { %v1959_v53 = vsel %vm517_vm6, %v1958_v32, %v1954_v43 }
 0x4b8   :  { %v1654_v61 = vpop.permute.xlu1 %1653 }
 0x4b9   :  { %v1963_v21 = vrot.slane %v1654_v61, %v2650_v26 }
 0x4bb   :  { %v1964_v10 = vsel %vm524_vm7, %v1963_v21, %v1959_v53 }
 0x4bc   :  { %v1969_v9 = vsel %vm531_vm8, %v1968_v33, %v1964_v10 }
 0x4bd   :  { %v1976_v60 = vsel %vm818_vm15, %v1969_v9, %v1975_v4 }
 0x4be   :  { %2134 = vmatmul.mubr.msk.f32.vlgmr.msra.gmra.mrb[2].mxu1 %vm149_vm0, %v1976_v60 }
 0x591   :  { %v2045_v38 = vpop.f32.mrb[2].mxu1 }
 0x592   :  { %v2046_v36 = vadd.f32 %v2071_v48, %v2045_v38  ;;  %v2135_v26 = vpop.f32.mrb[3].mxu1 }
 0x594   :  { %2049 = vst [vmem:[#allocation11] sm:$0xff] %v2046_v36 }
 0x595   :  { %2299 = shalt.err (!%p2296_p2)
}
 0x596   :  { %s2300_s21 = scalar_lea.hbm %s3240_s5, 128 }
 0x597   :  { %p2301_p3 = scmp.ne.s32.totalorder %s3240_s5, %s2300_s21  ;;  %p2304_p4 = scmp.lt.u32.totalorder %s2300_s21, %s3240_s5 }
 0x599   :  { %p2306_p5 = pnand %p2304_p4, %p2301_p3 }
 0x59b   :  { %2309 = shalt.err (!%p2306_p5)
}
 0x59c   :  { %2059 = dma.vmem_to_hbm [thread:$0]  %s2057_s27, 128, %s3240_s5, [#allocation4]  }
 0x59d   :  { %2316 = dma.done.wait [#allocation4], 128  }
 0x59e   :  { %2317 = vsyncadd [#allocation4], 4294967168 }
 0x59f   :  { %2063 = vsyncpa [#allocation3], 1 }
 0x5a0   :  { %2064 = vsyncpa [#allocation6], 1 }
 0x5a1   :  { %2065 = vsyncpa [#allocation9], 1 }
 0x5a2   :  { %2066 = vsyncpa [#allocation4], 1 }

</bundles_post_ra>
